<compile_context>
chip_gen: v5e
topology: v5e:2x2
jax: 0.10.0
libtpu: 0.0.40
codegen_flags: <defaults>
</compile_context>

<pallas_src>
import functools
import math

import jax
import jax.numpy as jnp
from jax import lax
from jax.experimental import pallas as pl
from jax.experimental.pallas import tpu as pltpu


def encoder_layer_kernel(
    x_ref,                    # (R, E)   R = batch_blk * S rows
    wqkv_ref, bqkv_ref,       # (E, 3E) bf16, (1, 3E) f32
    wo_ref, bo_ref,           # (E, E) bf16,  (1, E) f32
    g1_ref, be1_ref,          # LayerNorm1 gamma/beta (1, E) f32
    w1_ref, b1_ref,           # (E, F) bf16, (1, F) f32
    w2_ref, b2_ref,           # (F, E) bf16, (1, E) f32
    g2_ref, be2_ref,          # LayerNorm2 gamma/beta (1, E) f32
    o_ref,                    # (R, E)
    *, n_heads, head_dim, seq_len, batch_blk,
):
    eps = 1e-5
    H, D, S = n_heads, head_dim, seq_len
    E = H * D
    scale = 1.0 / math.sqrt(D)
    bf = jnp.bfloat16

    x = x_ref[...].astype(jnp.float32)            # residual stream stays f32

    # ---- fused QKV projection: one wide MXU matmul --------------------------
    qkv = jnp.dot(x.astype(bf), wqkv_ref[...],
                  preferred_element_type=jnp.float32) + bqkv_ref[...]
    q = qkv[:, :E] * scale                        # fold 1/sqrt(D) once
    k = qkv[:, E:2 * E]
    v = qkv[:, 2 * E:3 * E]

    # ---- multi-head self-attention, batched over the sequences in the block -
    # Short static loop over heads only; per head a batched (b, S, D) einsum
    # handles every sequence of the row block at once (no per-sequence unroll,
    # no sublane concatenate).
    ctx_heads = []
    for h in range(H):
        c0 = h * D
        q_h = q[:, c0:c0 + D].reshape(batch_blk, S, D)
        k_h = k[:, c0:c0 + D].reshape(batch_blk, S, D)
        v_h = v[:, c0:c0 + D].reshape(batch_blk, S, D)
        s = jnp.einsum("bqd,bkd->bqk", q_h, k_h,
                       preferred_element_type=jnp.float32)         # (b, S, S)
        s = s - jnp.max(s, axis=-1, keepdims=True)
        p = jnp.exp(s)
        p = p * pl.reciprocal(jnp.sum(p, axis=-1, keepdims=True), approx=True)
        ctx = jnp.einsum("bqk,bkd->bqd", p, v_h,
                         preferred_element_type=jnp.float32)       # (b, S, D)
        ctx_heads.append(ctx.reshape(batch_blk * S, D))
    ctx_all = ctx_heads[0] if H == 1 else jnp.concatenate(ctx_heads, axis=-1)

    # ---- single output projection over the full embedding (K = E) -----------
    attn = jnp.dot(ctx_all.astype(bf), wo_ref[...],
                   preferred_element_type=jnp.float32) + bo_ref[...]

    # ---- residual + LayerNorm 1 ----------------------------------------------
    h1 = x + attn
    mu1 = jnp.mean(h1, axis=-1, keepdims=True)
    var1 = jnp.mean((h1 - mu1) * (h1 - mu1), axis=-1, keepdims=True)
    h1n = (h1 - mu1) * lax.rsqrt(var1 + eps) * g1_ref[...] + be1_ref[...]

    # ---- position-wise feed-forward ------------------------------------------
    ff = jnp.dot(h1n.astype(bf), w1_ref[...],
                 preferred_element_type=jnp.float32) + b1_ref[...]
    ff = jnp.maximum(ff, 0.0)
    ff = jnp.dot(ff.astype(bf), w2_ref[...],
                 preferred_element_type=jnp.float32) + b2_ref[...]

    # ---- residual + LayerNorm 2 ----------------------------------------------
    h2 = h1n + ff
    mu2 = jnp.mean(h2, axis=-1, keepdims=True)
    var2 = jnp.mean((h2 - mu2) * (h2 - mu2), axis=-1, keepdims=True)
    out = (h2 - mu2) * lax.rsqrt(var2 + eps) * g2_ref[...] + be2_ref[...]

    o_ref[...] = out.astype(o_ref.dtype)


def _pick_batch_block(batch, seq, rows_target=256):
    """Whole sequences per grid step; prefer grid length >= 2 (v7x megacore),
    sublane-aligned row counts, and ~rows_target rows per block."""
    divisors = [d for d in range(1, batch + 1) if batch % d == 0]
    aligned = [d for d in divisors if d == batch or (d * seq) % 8 == 0]
    cap = max(1, batch // 2) if batch >= 2 else 1          # keep >= 2 grid steps
    capped = [d for d in aligned if d <= cap] or aligned
    target = max(1, rows_target // max(seq, 1))
    at_or_below = [d for d in capped if d <= target]
    return max(at_or_below) if at_or_below else min(capped)


def _vmem_limit_bytes(E, F, R):
    w = (E * 3 * E + E * E + E * F + F * E) * 2            # bf16 weights (1 copy)
    b = (3 * E + E + F + E + 4 * E) * 4                    # f32 biases + LN params
    act = R * (2 * 2 * E + 3 * E + 2 * E + F) * 4          # x/out (2-buf) + qkv + ctx/attn + ffn
    need = 2 * (w + b + act)                                # headroom
    return int(min(64 * 1024 * 1024, max(32 * 1024 * 1024, need)))


def encoder_layer(x, params, *, n_heads):
    B, S, E = x.shape
    F = params["w1"].shape[1]
    D = E // n_heads
    bf = jnp.bfloat16

    b_blk = _pick_batch_block(B, S)
    grid = (B // b_blk,)
    R = b_blk * S

    x2 = x.reshape(B * S, E)

    # Fused QKV weight/bias; matmul weights in bf16, biases/LN params in f32.
    wqkv = jnp.concatenate(
        [params["wq"], params["wk"], params["wv"]], axis=1).astype(bf)
    bqkv = jnp.concatenate([params["bq"], params["bk"], params["bv"]], axis=1)
    wo = params["wo"].astype(bf)
    w1 = params["w1"].astype(bf)
    w2 = params["w2"].astype(bf)

    kernel = functools.partial(
        encoder_layer_kernel,
        n_heads=n_heads, head_dim=D, seq_len=S, batch_blk=b_blk,
    )

    args = (x2, wqkv, bqkv, wo, params["bo"],
            params["g1"], params["be1"],
            w1, params["b1"], w2, params["b2"],
            params["g2"], params["be2"])

    vmem_limit = _vmem_limit_bytes(E, F, R)

    def build(single_buffer_weights):
        if single_buffer_weights:
            # Resident weights: constant block index -> single-buffer them.
            rep = lambda shape: pl.BlockSpec(shape, lambda i: (0, 0),
                                             pipeline_mode=pl.Buffered(1))
        else:
            rep = lambda shape: pl.BlockSpec(shape, lambda i: (0, 0))
        in_specs = [
            pl.BlockSpec((R, E), lambda i: (i, 0)),   # x rows (streamed)
            rep((E, 3 * E)), rep((1, 3 * E)),         # fused W_qkv, b_qkv
            rep((E, E)), rep((1, E)),                 # W_o, b_o
            rep((1, E)), rep((1, E)),                 # LN1 gamma, beta
            rep((E, F)), rep((1, F)),                 # FFN linear1
            rep((F, E)), rep((1, E)),                 # FFN linear2
            rep((1, E)), rep((1, E)),                 # LN2 gamma, beta
        ]
        return pl.pallas_call(
            kernel,
            out_shape=jax.ShapeDtypeStruct((B * S, E), x.dtype),
            grid_spec=pltpu.PrefetchScalarGridSpec(
                num_scalar_prefetch=0,
                grid=grid,
                in_specs=in_specs,
                out_specs=pl.BlockSpec((R, E), lambda i: (i, 0)),
            ),
            compiler_params=pltpu.CompilerParams(
                dimension_semantics=("parallel",),    # shard row blocks (v7x 2 TCs)
                vmem_limit_bytes=vmem_limit,
            ),
        )

    try:
        out = build(True)(*args)
    except Exception:
        # pipeline_mode=pl.Buffered(1) unsupported on this jax build -> default.
        out = build(False)(*args)

    return out.reshape(B, S, E)


def reference_encoder_layer(x, params, *, n_heads):
    """Pure-JAX reference with the same numerics (bf16 matmul inputs, f32
    accumulation, f32 softmax/LayerNorm) for validation."""
    B, S, E = x.shape
    D = E // n_heads
    eps = 1e-5
    bf = jnp.bfloat16

    def mm(a, w):
        return jnp.dot(a.astype(bf), w.astype(bf),
                       preferred_element_type=jnp.float32)

    q = mm(x, params["wq"]) + params["bq"]
    k = mm(x, params["wk"]) + params["bk"]
    v = mm(x, params["wv"]) + params["bv"]
    q = q.reshape(B, S, n_heads, D).transpose(0, 2, 1, 3)
    k = k.reshape(B, S, n_heads, D).transpose(0, 2, 1, 3)
    v = v.reshape(B, S, n_heads, D).transpose(0, 2, 1, 3)
    scores = jnp.einsum("bhqd,bhkd->bhqk", q, k) / math.sqrt(D)
    p = jax.nn.softmax(scores, axis=-1)
    ctx = jnp.einsum("bhqk,bhkd->bhqd", p, v).transpose(0, 2, 1, 3).reshape(B, S, E)
    attn = mm(ctx, params["wo"]) + params["bo"]

    def ln(h, g, b):
        mu = jnp.mean(h, axis=-1, keepdims=True)
        var = jnp.mean((h - mu) ** 2, axis=-1, keepdims=True)
        return (h - mu) * lax.rsqrt(var + eps) * g + b

    h1 = ln(x + attn, params["g1"], params["be1"])
    ff = jnp.maximum(mm(h1, params["w1"]) + params["b1"], 0.0)
    ff = mm(ff, params["w2"]) + params["b2"]
    return ln(h1 + ff, params["g2"], params["be2"])


if __name__ == "__main__":
    # config: emb_dim=32, n_heads=4, drop_rate=0.0 (identity), qkv_bias=True
    B, S, E, H = 2, 8, 32, 4
    F = 4 * E

    key = jax.random.PRNGKey(0)
    ks = jax.random.split(key, 12)
    std = 0.02

    params = {
        "wq": jax.random.normal(ks[0], (E, E), jnp.float32) * std,
        "bq": jax.random.normal(ks[1], (1, E), jnp.float32) * std,
        "wk": jax.random.normal(ks[2], (E, E), jnp.float32) * std,
        "bk": jax.random.normal(ks[3], (1, E), jnp.float32) * std,
        "wv": jax.random.normal(ks[4], (E, E), jnp.float32) * std,
        "bv": jax.random.normal(ks[5], (1, E), jnp.float32) * std,
        "wo": jax.random.normal(ks[6], (E, E), jnp.float32) * std,
        "bo": jax.random.normal(ks[7], (1, E), jnp.float32) * std,
        "g1": jnp.ones((1, E), jnp.float32),
        "be1": jnp.zeros((1, E), jnp.float32),
        "w1": jax.random.normal(ks[8], (E, F), jnp.float32) * std,
        "b1": jax.random.normal(ks[9], (1, F), jnp.float32) * std,
        "w2": jax.random.normal(ks[10], (F, E), jnp.float32) * std,
        "b2": jax.random.normal(ks[11], (1, E), jnp.float32) * std,
        "g2": jnp.ones((1, E), jnp.float32),
        "be2": jnp.zeros((1, E), jnp.float32),
    }

    x = jax.random.normal(jax.random.PRNGKey(42), (B, S, E), jnp.float32)

    out = encoder_layer(x, params, n_heads=H)
    out = jax.block_until_ready(out)

    ref = reference_encoder_layer(x, params, n_heads=H)
    assert out.shape == (B, S, E)
    # tolerance covers pl.reciprocal(approx=True) in the softmax and MXU vs XLA
    # accumulation-order differences (both sides use identical bf16 casts).
    assert jnp.allclose(out, ref, atol=2e-3, rtol=2e-3), "mismatch vs JAX reference"

    print("KERNEL_OK")
</pallas_src>

<mosaic_0001>
module attributes {stable_mosaic.version = 11 : i64} {
  func.func @encoder_layer_kernel(%arg0: i32, %arg1: memref<8x32xf32, #tpu.memory_space<vmem>>, %arg2: memref<32x96xbf16, #tpu.memory_space<vmem>>, %arg3: memref<1x96xf32, #tpu.memory_space<vmem>>, %arg4: memref<32x32xbf16, #tpu.memory_space<vmem>>, %arg5: memref<1x32xf32, #tpu.memory_space<vmem>>, %arg6: memref<1x32xf32, #tpu.memory_space<vmem>>, %arg7: memref<1x32xf32, #tpu.memory_space<vmem>>, %arg8: memref<32x128xbf16, #tpu.memory_space<vmem>>, %arg9: memref<1x128xf32, #tpu.memory_space<vmem>>, %arg10: memref<128x32xbf16, #tpu.memory_space<vmem>>, %arg11: memref<1x32xf32, #tpu.memory_space<vmem>>, %arg12: memref<1x32xf32, #tpu.memory_space<vmem>>, %arg13: memref<1x32xf32, #tpu.memory_space<vmem>>, %arg14: memref<8x32xf32, #tpu.memory_space<vmem>>) attributes {dimension_semantics = [#tpu.dimension_semantics<parallel>], iteration_bounds = array<i64: 2>, scalar_prefetch = 0 : i64, scratch_operands = 0 : i64, tpu.core_type = #tpu.core_type<tc>, window_params = [{transform_indices = @transform_0, window_bounds = array<i64: 8, 32>}, {pipeline_mode = #tpu.pipeline_mode<synchronous>, transform_indices = @transform_1, window_bounds = array<i64: 32, 96>}, {pipeline_mode = #tpu.pipeline_mode<synchronous>, transform_indices = @transform_2, window_bounds = array<i64: 1, 96>}, {pipeline_mode = #tpu.pipeline_mode<synchronous>, transform_indices = @transform_3, window_bounds = array<i64: 32, 32>}, {pipeline_mode = #tpu.pipeline_mode<synchronous>, transform_indices = @transform_4, window_bounds = array<i64: 1, 32>}, {pipeline_mode = #tpu.pipeline_mode<synchronous>, transform_indices = @transform_5, window_bounds = array<i64: 1, 32>}, {pipeline_mode = #tpu.pipeline_mode<synchronous>, transform_indices = @transform_6, window_bounds = array<i64: 1, 32>}, {pipeline_mode = #tpu.pipeline_mode<synchronous>, transform_indices = @transform_7, window_bounds = array<i64: 32, 128>}, {pipeline_mode = #tpu.pipeline_mode<synchronous>, transform_indices = @transform_8, window_bounds = array<i64: 1, 128>}, {pipeline_mode = #tpu.pipeline_mode<synchronous>, transform_indices = @transform_9, window_bounds = array<i64: 128, 32>}, {pipeline_mode = #tpu.pipeline_mode<synchronous>, transform_indices = @transform_10, window_bounds = array<i64: 1, 32>}, {pipeline_mode = #tpu.pipeline_mode<synchronous>, transform_indices = @transform_11, window_bounds = array<i64: 1, 32>}, {pipeline_mode = #tpu.pipeline_mode<synchronous>, transform_indices = @transform_12, window_bounds = array<i64: 1, 32>}, {transform_indices = @transform_13, window_bounds = array<i64: 8, 32>}]} {
    %c0 = arith.constant 0 : index
    %c0_0 = arith.constant 0 : index
    %0 = vector.load %arg1[%c0, %c0_0] : memref<8x32xf32, #tpu.memory_space<vmem>>, vector<8x32xf32>
    %1 = arith.truncf %0 : vector<8x32xf32> to vector<8x32xbf16>
    %c0_1 = arith.constant 0 : index
    %c0_2 = arith.constant 0 : index
    %2 = vector.load %arg2[%c0_1, %c0_2] : memref<32x96xbf16, #tpu.memory_space<vmem>>, vector<32x96xbf16>
    %cst = arith.constant dense<0.000000e+00> : vector<8x96xf32>
    %3 = tpu.matmul %1, %2, %cst {dimension_numbers = #tpu.dot_dimension_numbers<[1], [0], [0], [1], [0, 0, 1, 1], [], []>} : vector<8x32xbf16>, vector<32x96xbf16>, vector<8x96xf32> -> vector<8x96xf32>
    %c0_3 = arith.constant 0 : index
    %c0_4 = arith.constant 0 : index
    %4 = vector.load %arg3[%c0_3, %c0_4] : memref<1x96xf32, #tpu.memory_space<vmem>>, vector<1x96xf32>
    %5 = vector.broadcast %4 : vector<1x96xf32> to vector<8x96xf32>
    %6 = arith.addf %3, %5 : vector<8x96xf32>
    %7 = vector.extract_strided_slice %6 {offsets = [0, 0], sizes = [8, 32], strides = [1, 1]} : vector<8x96xf32> to vector<8x32xf32>
    %cst_5 = arith.constant 0.353553385 : f32
    %8 = vector.broadcast %cst_5 : f32 to vector<8x32xf32>
    %9 = arith.mulf %7, %8 : vector<8x32xf32>
    %10 = vector.extract_strided_slice %6 {offsets = [0, 32], sizes = [8, 32], strides = [1, 1]} : vector<8x96xf32> to vector<8x32xf32>
    %11 = vector.extract_strided_slice %6 {offsets = [0, 64], sizes = [8, 32], strides = [1, 1]} : vector<8x96xf32> to vector<8x32xf32>
    %12 = vector.extract_strided_slice %9 {offsets = [0, 0], sizes = [8, 8], strides = [1, 1]} : vector<8x32xf32> to vector<8x8xf32>
    %13 = vector.shape_cast %12 : vector<8x8xf32> to vector<1x8x8xf32>
    %14 = vector.extract_strided_slice %10 {offsets = [0, 0], sizes = [8, 8], strides = [1, 1]} : vector<8x32xf32> to vector<8x8xf32>
    %15 = vector.shape_cast %14 : vector<8x8xf32> to vector<1x8x8xf32>
    %16 = vector.extract_strided_slice %11 {offsets = [0, 0], sizes = [8, 8], strides = [1, 1]} : vector<8x32xf32> to vector<8x8xf32>
    %17 = vector.shape_cast %16 : vector<8x8xf32> to vector<1x8x8xf32>
    "tpu.trace_start"() <{level = 10 : i32, message = "bqd,bkd->bqk"}> : () -> ()
    %cst_6 = arith.constant dense<0.000000e+00> : vector<1x8x8xf32>
    %18 = tpu.matmul %13, %15, %cst_6 {dimension_numbers = #tpu.dot_dimension_numbers<[2], [2], [1], [1], [0, 0, 0, 1, 1, 1], [0], [0]>} : vector<1x8x8xf32>, vector<1x8x8xf32>, vector<1x8x8xf32> -> vector<1x8x8xf32>
    "tpu.trace_stop"() : () -> ()
    %cst_7 = arith.constant dense<0xFF800000> : vector<1x8xf32>
    %19 = vector.multi_reduction <maximumf>, %18, %cst_7 [2] : vector<1x8x8xf32> to vector<1x8xf32>
    %20 = vector.shape_cast %19 : vector<1x8xf32> to vector<1x8x1xf32>
    %21 = vector.broadcast %20 : vector<1x8x1xf32> to vector<1x8x8xf32>
    %22 = arith.subf %18, %21 : vector<1x8x8xf32>
    %23 = math.exp %22 : vector<1x8x8xf32>
    %cst_8 = arith.constant dense<0.000000e+00> : vector<1x8xf32>
    %24 = vector.multi_reduction <add>, %23, %cst_8 [2] : vector<1x8x8xf32> to vector<1x8xf32>
    %25 = vector.shape_cast %24 : vector<1x8xf32> to vector<1x8x1xf32>
    %26 = tpu.reciprocal %25 {approx = true} : vector<1x8x1xf32> -> vector<1x8x1xf32>
    %27 = vector.broadcast %26 : vector<1x8x1xf32> to vector<1x8x8xf32>
    %28 = arith.mulf %23, %27 : vector<1x8x8xf32>
    "tpu.trace_start"() <{level = 10 : i32, message = "bqk,bkd->bqd"}> : () -> ()
    %cst_9 = arith.constant dense<0.000000e+00> : vector<1x8x8xf32>
    %29 = tpu.matmul %28, %17, %cst_9 {dimension_numbers = #tpu.dot_dimension_numbers<[2], [1], [1], [2], [0, 0, 0, 1, 1, 2], [0], [0]>} : vector<1x8x8xf32>, vector<1x8x8xf32>, vector<1x8x8xf32> -> vector<1x8x8xf32>
    "tpu.trace_stop"() : () -> ()
    %30 = vector.shape_cast %29 : vector<1x8x8xf32> to vector<8x8xf32>
    %31 = vector.extract_strided_slice %9 {offsets = [0, 8], sizes = [8, 8], strides = [1, 1]} : vector<8x32xf32> to vector<8x8xf32>
    %32 = vector.shape_cast %31 : vector<8x8xf32> to vector<1x8x8xf32>
    %33 = vector.extract_strided_slice %10 {offsets = [0, 8], sizes = [8, 8], strides = [1, 1]} : vector<8x32xf32> to vector<8x8xf32>
    %34 = vector.shape_cast %33 : vector<8x8xf32> to vector<1x8x8xf32>
    %35 = vector.extract_strided_slice %11 {offsets = [0, 8], sizes = [8, 8], strides = [1, 1]} : vector<8x32xf32> to vector<8x8xf32>
    %36 = vector.shape_cast %35 : vector<8x8xf32> to vector<1x8x8xf32>
    "tpu.trace_start"() <{level = 10 : i32, message = "bqd,bkd->bqk"}> : () -> ()
    %cst_10 = arith.constant dense<0.000000e+00> : vector<1x8x8xf32>
    %37 = tpu.matmul %32, %34, %cst_10 {dimension_numbers = #tpu.dot_dimension_numbers<[2], [2], [1], [1], [0, 0, 0, 1, 1, 1], [0], [0]>} : vector<1x8x8xf32>, vector<1x8x8xf32>, vector<1x8x8xf32> -> vector<1x8x8xf32>
    "tpu.trace_stop"() : () -> ()
    %cst_11 = arith.constant dense<0xFF800000> : vector<1x8xf32>
    %38 = vector.multi_reduction <maximumf>, %37, %cst_11 [2] : vector<1x8x8xf32> to vector<1x8xf32>
    %39 = vector.shape_cast %38 : vector<1x8xf32> to vector<1x8x1xf32>
    %40 = vector.broadcast %39 : vector<1x8x1xf32> to vector<1x8x8xf32>
    %41 = arith.subf %37, %40 : vector<1x8x8xf32>
    %42 = math.exp %41 : vector<1x8x8xf32>
    %cst_12 = arith.constant dense<0.000000e+00> : vector<1x8xf32>
    %43 = vector.multi_reduction <add>, %42, %cst_12 [2] : vector<1x8x8xf32> to vector<1x8xf32>
    %44 = vector.shape_cast %43 : vector<1x8xf32> to vector<1x8x1xf32>
    %45 = tpu.reciprocal %44 {approx = true} : vector<1x8x1xf32> -> vector<1x8x1xf32>
    %46 = vector.broadcast %45 : vector<1x8x1xf32> to vector<1x8x8xf32>
    %47 = arith.mulf %42, %46 : vector<1x8x8xf32>
    "tpu.trace_start"() <{level = 10 : i32, message = "bqk,bkd->bqd"}> : () -> ()
    %cst_13 = arith.constant dense<0.000000e+00> : vector<1x8x8xf32>
    %48 = tpu.matmul %47, %36, %cst_13 {dimension_numbers = #tpu.dot_dimension_numbers<[2], [1], [1], [2], [0, 0, 0, 1, 1, 2], [0], [0]>} : vector<1x8x8xf32>, vector<1x8x8xf32>, vector<1x8x8xf32> -> vector<1x8x8xf32>
    "tpu.trace_stop"() : () -> ()
    %49 = vector.shape_cast %48 : vector<1x8x8xf32> to vector<8x8xf32>
    %50 = vector.extract_strided_slice %9 {offsets = [0, 16], sizes = [8, 8], strides = [1, 1]} : vector<8x32xf32> to vector<8x8xf32>
    %51 = vector.shape_cast %50 : vector<8x8xf32> to vector<1x8x8xf32>
    %52 = vector.extract_strided_slice %10 {offsets = [0, 16], sizes = [8, 8], strides = [1, 1]} : vector<8x32xf32> to vector<8x8xf32>
    %53 = vector.shape_cast %52 : vector<8x8xf32> to vector<1x8x8xf32>
    %54 = vector.extract_strided_slice %11 {offsets = [0, 16], sizes = [8, 8], strides = [1, 1]} : vector<8x32xf32> to vector<8x8xf32>
    %55 = vector.shape_cast %54 : vector<8x8xf32> to vector<1x8x8xf32>
    "tpu.trace_start"() <{level = 10 : i32, message = "bqd,bkd->bqk"}> : () -> ()
    %cst_14 = arith.constant dense<0.000000e+00> : vector<1x8x8xf32>
    %56 = tpu.matmul %51, %53, %cst_14 {dimension_numbers = #tpu.dot_dimension_numbers<[2], [2], [1], [1], [0, 0, 0, 1, 1, 1], [0], [0]>} : vector<1x8x8xf32>, vector<1x8x8xf32>, vector<1x8x8xf32> -> vector<1x8x8xf32>
    "tpu.trace_stop"() : () -> ()
    %cst_15 = arith.constant dense<0xFF800000> : vector<1x8xf32>
    %57 = vector.multi_reduction <maximumf>, %56, %cst_15 [2] : vector<1x8x8xf32> to vector<1x8xf32>
    %58 = vector.shape_cast %57 : vector<1x8xf32> to vector<1x8x1xf32>
    %59 = vector.broadcast %58 : vector<1x8x1xf32> to vector<1x8x8xf32>
    %60 = arith.subf %56, %59 : vector<1x8x8xf32>
    %61 = math.exp %60 : vector<1x8x8xf32>
    %cst_16 = arith.constant dense<0.000000e+00> : vector<1x8xf32>
    %62 = vector.multi_reduction <add>, %61, %cst_16 [2] : vector<1x8x8xf32> to vector<1x8xf32>
    %63 = vector.shape_cast %62 : vector<1x8xf32> to vector<1x8x1xf32>
    %64 = tpu.reciprocal %63 {approx = true} : vector<1x8x1xf32> -> vector<1x8x1xf32>
    %65 = vector.broadcast %64 : vector<1x8x1xf32> to vector<1x8x8xf32>
    %66 = arith.mulf %61, %65 : vector<1x8x8xf32>
    "tpu.trace_start"() <{level = 10 : i32, message = "bqk,bkd->bqd"}> : () -> ()
    %cst_17 = arith.constant dense<0.000000e+00> : vector<1x8x8xf32>
    %67 = tpu.matmul %66, %55, %cst_17 {dimension_numbers = #tpu.dot_dimension_numbers<[2], [1], [1], [2], [0, 0, 0, 1, 1, 2], [0], [0]>} : vector<1x8x8xf32>, vector<1x8x8xf32>, vector<1x8x8xf32> -> vector<1x8x8xf32>
    "tpu.trace_stop"() : () -> ()
    %68 = vector.shape_cast %67 : vector<1x8x8xf32> to vector<8x8xf32>
    %69 = vector.extract_strided_slice %9 {offsets = [0, 24], sizes = [8, 8], strides = [1, 1]} : vector<8x32xf32> to vector<8x8xf32>
    %70 = vector.shape_cast %69 : vector<8x8xf32> to vector<1x8x8xf32>
    %71 = vector.extract_strided_slice %10 {offsets = [0, 24], sizes = [8, 8], strides = [1, 1]} : vector<8x32xf32> to vector<8x8xf32>
    %72 = vector.shape_cast %71 : vector<8x8xf32> to vector<1x8x8xf32>
    %73 = vector.extract_strided_slice %11 {offsets = [0, 24], sizes = [8, 8], strides = [1, 1]} : vector<8x32xf32> to vector<8x8xf32>
    %74 = vector.shape_cast %73 : vector<8x8xf32> to vector<1x8x8xf32>
    "tpu.trace_start"() <{level = 10 : i32, message = "bqd,bkd->bqk"}> : () -> ()
    %cst_18 = arith.constant dense<0.000000e+00> : vector<1x8x8xf32>
    %75 = tpu.matmul %70, %72, %cst_18 {dimension_numbers = #tpu.dot_dimension_numbers<[2], [2], [1], [1], [0, 0, 0, 1, 1, 1], [0], [0]>} : vector<1x8x8xf32>, vector<1x8x8xf32>, vector<1x8x8xf32> -> vector<1x8x8xf32>
    "tpu.trace_stop"() : () -> ()
    %cst_19 = arith.constant dense<0xFF800000> : vector<1x8xf32>
    %76 = vector.multi_reduction <maximumf>, %75, %cst_19 [2] : vector<1x8x8xf32> to vector<1x8xf32>
    %77 = vector.shape_cast %76 : vector<1x8xf32> to vector<1x8x1xf32>
    %78 = vector.broadcast %77 : vector<1x8x1xf32> to vector<1x8x8xf32>
    %79 = arith.subf %75, %78 : vector<1x8x8xf32>
    %80 = math.exp %79 : vector<1x8x8xf32>
    %cst_20 = arith.constant dense<0.000000e+00> : vector<1x8xf32>
    %81 = vector.multi_reduction <add>, %80, %cst_20 [2] : vector<1x8x8xf32> to vector<1x8xf32>
    %82 = vector.shape_cast %81 : vector<1x8xf32> to vector<1x8x1xf32>
    %83 = tpu.reciprocal %82 {approx = true} : vector<1x8x1xf32> -> vector<1x8x1xf32>
    %84 = vector.broadcast %83 : vector<1x8x1xf32> to vector<1x8x8xf32>
    %85 = arith.mulf %80, %84 : vector<1x8x8xf32>
    "tpu.trace_start"() <{level = 10 : i32, message = "bqk,bkd->bqd"}> : () -> ()
    %cst_21 = arith.constant dense<0.000000e+00> : vector<1x8x8xf32>
    %86 = tpu.matmul %85, %74, %cst_21 {dimension_numbers = #tpu.dot_dimension_numbers<[2], [1], [1], [2], [0, 0, 0, 1, 1, 2], [0], [0]>} : vector<1x8x8xf32>, vector<1x8x8xf32>, vector<1x8x8xf32> -> vector<1x8x8xf32>
    "tpu.trace_stop"() : () -> ()
    %87 = vector.shape_cast %86 : vector<1x8x8xf32> to vector<8x8xf32>
    %88 = tpu.concatenate %30, %49, %68, %87 in 1 : vector<8x8xf32>, vector<8x8xf32>, vector<8x8xf32>, vector<8x8xf32> -> vector<8x32xf32>
    %89 = arith.truncf %88 : vector<8x32xf32> to vector<8x32xbf16>
    %c0_22 = arith.constant 0 : index
    %c0_23 = arith.constant 0 : index
    %90 = vector.load %arg4[%c0_22, %c0_23] : memref<32x32xbf16, #tpu.memory_space<vmem>>, vector<32x32xbf16>
    %cst_24 = arith.constant dense<0.000000e+00> : vector<8x32xf32>
    %91 = tpu.matmul %89, %90, %cst_24 {dimension_numbers = #tpu.dot_dimension_numbers<[1], [0], [0], [1], [0, 0, 1, 1], [], []>} : vector<8x32xbf16>, vector<32x32xbf16>, vector<8x32xf32> -> vector<8x32xf32>
    %c0_25 = arith.constant 0 : index
    %c0_26 = arith.constant 0 : index
    %92 = vector.load %arg5[%c0_25, %c0_26] : memref<1x32xf32, #tpu.memory_space<vmem>>, vector<1x32xf32>
    %93 = vector.broadcast %92 : vector<1x32xf32> to vector<8x32xf32>
    %94 = arith.addf %91, %93 : vector<8x32xf32>
    %95 = arith.addf %0, %94 : vector<8x32xf32>
    %cst_27 = arith.constant dense<0.000000e+00> : vector<8xf32>
    %96 = vector.multi_reduction <add>, %95, %cst_27 [1] : vector<8x32xf32> to vector<8xf32>
    %97 = vector.shape_cast %96 : vector<8xf32> to vector<8x1xf32>
    %cst_28 = arith.constant 3.200000e+01 : f32
    %98 = vector.broadcast %cst_28 : f32 to vector<8x1xf32>
    %99 = arith.divf %97, %98 : vector<8x1xf32>
    %100 = vector.broadcast %99 : vector<8x1xf32> to vector<8x32xf32>
    %101 = arith.subf %95, %100 : vector<8x32xf32>
    %102 = vector.broadcast %99 : vector<8x1xf32> to vector<8x32xf32>
    %103 = arith.subf %95, %102 : vector<8x32xf32>
    %104 = arith.mulf %101, %103 : vector<8x32xf32>
    %cst_29 = arith.constant dense<0.000000e+00> : vector<8xf32>
    %105 = vector.multi_reduction <add>, %104, %cst_29 [1] : vector<8x32xf32> to vector<8xf32>
    %106 = vector.shape_cast %105 : vector<8xf32> to vector<8x1xf32>
    %cst_30 = arith.constant 3.200000e+01 : f32
    %107 = vector.broadcast %cst_30 : f32 to vector<8x1xf32>
    %108 = arith.divf %106, %107 : vector<8x1xf32>
    %109 = vector.broadcast %99 : vector<8x1xf32> to vector<8x32xf32>
    %110 = arith.subf %95, %109 : vector<8x32xf32>
    %cst_31 = arith.constant 9.99999974E-6 : f32
    %111 = vector.broadcast %cst_31 : f32 to vector<8x1xf32>
    %112 = arith.addf %108, %111 : vector<8x1xf32>
    %113 = math.rsqrt %112 : vector<8x1xf32>
    %114 = vector.broadcast %113 : vector<8x1xf32> to vector<8x32xf32>
    %115 = arith.mulf %110, %114 : vector<8x32xf32>
    %c0_32 = arith.constant 0 : index
    %c0_33 = arith.constant 0 : index
    %116 = vector.load %arg6[%c0_32, %c0_33] : memref<1x32xf32, #tpu.memory_space<vmem>>, vector<1x32xf32>
    %117 = vector.broadcast %116 : vector<1x32xf32> to vector<8x32xf32>
    %118 = arith.mulf %115, %117 : vector<8x32xf32>
    %c0_34 = arith.constant 0 : index
    %c0_35 = arith.constant 0 : index
    %119 = vector.load %arg7[%c0_34, %c0_35] : memref<1x32xf32, #tpu.memory_space<vmem>>, vector<1x32xf32>
    %120 = vector.broadcast %119 : vector<1x32xf32> to vector<8x32xf32>
    %121 = arith.addf %118, %120 : vector<8x32xf32>
    %122 = arith.truncf %121 : vector<8x32xf32> to vector<8x32xbf16>
    %c0_36 = arith.constant 0 : index
    %c0_37 = arith.constant 0 : index
    %123 = vector.load %arg8[%c0_36, %c0_37] : memref<32x128xbf16, #tpu.memory_space<vmem>>, vector<32x128xbf16>
    %cst_38 = arith.constant dense<0.000000e+00> : vector<8x128xf32>
    %124 = tpu.matmul %122, %123, %cst_38 {dimension_numbers = #tpu.dot_dimension_numbers<[1], [0], [0], [1], [0, 0, 1, 1], [], []>} : vector<8x32xbf16>, vector<32x128xbf16>, vector<8x128xf32> -> vector<8x128xf32>
    %c0_39 = arith.constant 0 : index
    %c0_40 = arith.constant 0 : index
    %125 = vector.load %arg9[%c0_39, %c0_40] : memref<1x128xf32, #tpu.memory_space<vmem>>, vector<1x128xf32>
    %126 = vector.broadcast %125 : vector<1x128xf32> to vector<8x128xf32>
    %127 = arith.addf %124, %126 : vector<8x128xf32>
    %cst_41 = arith.constant 0.000000e+00 : f32
    %128 = vector.broadcast %cst_41 : f32 to vector<8x128xf32>
    %129 = arith.maximumf %127, %128 : vector<8x128xf32>
    %130 = arith.truncf %129 : vector<8x128xf32> to vector<8x128xbf16>
    %c0_42 = arith.constant 0 : index
    %c0_43 = arith.constant 0 : index
    %131 = vector.load %arg10[%c0_42, %c0_43] : memref<128x32xbf16, #tpu.memory_space<vmem>>, vector<128x32xbf16>
    %cst_44 = arith.constant dense<0.000000e+00> : vector<8x32xf32>
    %132 = tpu.matmul %130, %131, %cst_44 {dimension_numbers = #tpu.dot_dimension_numbers<[1], [0], [0], [1], [0, 0, 1, 1], [], []>} : vector<8x128xbf16>, vector<128x32xbf16>, vector<8x32xf32> -> vector<8x32xf32>
    %c0_45 = arith.constant 0 : index
    %c0_46 = arith.constant 0 : index
    %133 = vector.load %arg11[%c0_45, %c0_46] : memref<1x32xf32, #tpu.memory_space<vmem>>, vector<1x32xf32>
    %134 = vector.broadcast %133 : vector<1x32xf32> to vector<8x32xf32>
    %135 = arith.addf %132, %134 : vector<8x32xf32>
    %136 = arith.addf %121, %135 : vector<8x32xf32>
    %cst_47 = arith.constant dense<0.000000e+00> : vector<8xf32>
    %137 = vector.multi_reduction <add>, %136, %cst_47 [1] : vector<8x32xf32> to vector<8xf32>
    %138 = vector.shape_cast %137 : vector<8xf32> to vector<8x1xf32>
    %cst_48 = arith.constant 3.200000e+01 : f32
    %139 = vector.broadcast %cst_48 : f32 to vector<8x1xf32>
    %140 = arith.divf %138, %139 : vector<8x1xf32>
    %141 = vector.broadcast %140 : vector<8x1xf32> to vector<8x32xf32>
    %142 = arith.subf %136, %141 : vector<8x32xf32>
    %143 = vector.broadcast %140 : vector<8x1xf32> to vector<8x32xf32>
    %144 = arith.subf %136, %143 : vector<8x32xf32>
    %145 = arith.mulf %142, %144 : vector<8x32xf32>
    %cst_49 = arith.constant dense<0.000000e+00> : vector<8xf32>
    %146 = vector.multi_reduction <add>, %145, %cst_49 [1] : vector<8x32xf32> to vector<8xf32>
    %147 = vector.shape_cast %146 : vector<8xf32> to vector<8x1xf32>
    %cst_50 = arith.constant 3.200000e+01 : f32
    %148 = vector.broadcast %cst_50 : f32 to vector<8x1xf32>
    %149 = arith.divf %147, %148 : vector<8x1xf32>
    %150 = vector.broadcast %140 : vector<8x1xf32> to vector<8x32xf32>
    %151 = arith.subf %136, %150 : vector<8x32xf32>
    %cst_51 = arith.constant 9.99999974E-6 : f32
    %152 = vector.broadcast %cst_51 : f32 to vector<8x1xf32>
    %153 = arith.addf %149, %152 : vector<8x1xf32>
    %154 = math.rsqrt %153 : vector<8x1xf32>
    %155 = vector.broadcast %154 : vector<8x1xf32> to vector<8x32xf32>
    %156 = arith.mulf %151, %155 : vector<8x32xf32>
    %c0_52 = arith.constant 0 : index
    %c0_53 = arith.constant 0 : index
    %157 = vector.load %arg12[%c0_52, %c0_53] : memref<1x32xf32, #tpu.memory_space<vmem>>, vector<1x32xf32>
    %158 = vector.broadcast %157 : vector<1x32xf32> to vector<8x32xf32>
    %159 = arith.mulf %156, %158 : vector<8x32xf32>
    %c0_54 = arith.constant 0 : index
    %c0_55 = arith.constant 0 : index
    %160 = vector.load %arg13[%c0_54, %c0_55] : memref<1x32xf32, #tpu.memory_space<vmem>>, vector<1x32xf32>
    %161 = vector.broadcast %160 : vector<1x32xf32> to vector<8x32xf32>
    %162 = arith.addf %159, %161 : vector<8x32xf32>
    %c0_56 = arith.constant 0 : index
    %c0_57 = arith.constant 0 : index
    %163 = vector.load %arg14[%c0_56, %c0_57] : memref<8x32xf32, #tpu.memory_space<vmem>>, vector<8x32xf32>
    tpu.vector_store %arg14[%c0_56, %c0_57], %162 {strides = array<i32>} : memref<8x32xf32, #tpu.memory_space<vmem>>, vector<8x32xf32>,
    return
  }
  func.func @transform_0(%arg0: i32) -> (i32, i32) {
    %c0_i32 = arith.constant 0 : i32
    %c0_i32_0 = arith.constant 0 : i32
    return %arg0, %c0_i32 : i32, i32
  }
  func.func @transform_1(%arg0: i32) -> (i32, i32) {
    %c0_i32 = arith.constant 0 : i32
    %c0_i32_0 = arith.constant 0 : i32
    %c0_i32_1 = arith.constant 0 : i32
    return %c0_i32, %c0_i32_0 : i32, i32
  }
  func.func @transform_2(%arg0: i32) -> (i32, i32) {
    %c0_i32 = arith.constant 0 : i32
    %c0_i32_0 = arith.constant 0 : i32
    %c0_i32_1 = arith.constant 0 : i32
    return %c0_i32, %c0_i32_0 : i32, i32
  }
  func.func @transform_3(%arg0: i32) -> (i32, i32) {
    %c0_i32 = arith.constant 0 : i32
    %c0_i32_0 = arith.constant 0 : i32
    %c0_i32_1 = arith.constant 0 : i32
    return %c0_i32, %c0_i32_0 : i32, i32
  }
  func.func @transform_4(%arg0: i32) -> (i32, i32) {
    %c0_i32 = arith.constant 0 : i32
    %c0_i32_0 = arith.constant 0 : i32
    %c0_i32_1 = arith.constant 0 : i32
    return %c0_i32, %c0_i32_0 : i32, i32
  }
  func.func @transform_5(%arg0: i32) -> (i32, i32) {
    %c0_i32 = arith.constant 0 : i32
    %c0_i32_0 = arith.constant 0 : i32
    %c0_i32_1 = arith.constant 0 : i32
    return %c0_i32, %c0_i32_0 : i32, i32
  }
  func.func @transform_6(%arg0: i32) -> (i32, i32) {
    %c0_i32 = arith.constant 0 : i32
    %c0_i32_0 = arith.constant 0 : i32
    %c0_i32_1 = arith.constant 0 : i32
    return %c0_i32, %c0_i32_0 : i32, i32
  }
  func.func @transform_7(%arg0: i32) -> (i32, i32) {
    %c0_i32 = arith.constant 0 : i32
    %c0_i32_0 = arith.constant 0 : i32
    %c0_i32_1 = arith.constant 0 : i32
    return %c0_i32, %c0_i32_0 : i32, i32
  }
  func.func @transform_8(%arg0: i32) -> (i32, i32) {
    %c0_i32 = arith.constant 0 : i32
    %c0_i32_0 = arith.constant 0 : i32
    %c0_i32_1 = arith.constant 0 : i32
    return %c0_i32, %c0_i32_0 : i32, i32
  }
  func.func @transform_9(%arg0: i32) -> (i32, i32) {
    %c0_i32 = arith.constant 0 : i32
    %c0_i32_0 = arith.constant 0 : i32
    %c0_i32_1 = arith.constant 0 : i32
    return %c0_i32, %c0_i32_0 : i32, i32
  }
  func.func @transform_10(%arg0: i32) -> (i32, i32) {
    %c0_i32 = arith.constant 0 : i32
    %c0_i32_0 = arith.constant 0 : i32
    %c0_i32_1 = arith.constant 0 : i32
    return %c0_i32, %c0_i32_0 : i32, i32
  }
  func.func @transform_11(%arg0: i32) -> (i32, i32) {
    %c0_i32 = arith.constant 0 : i32
    %c0_i32_0 = arith.constant 0 : i32
    %c0_i32_1 = arith.constant 0 : i32
    return %c0_i32, %c0_i32_0 : i32, i32
  }
  func.func @transform_12(%arg0: i32) -> (i32, i32) {
    %c0_i32 = arith.constant 0 : i32
    %c0_i32_0 = arith.constant 0 : i32
    %c0_i32_1 = arith.constant 0 : i32
    return %c0_i32, %c0_i32_0 : i32, i32
  }
  func.func @transform_13(%arg0: i32) -> (i32, i32) {
    %c0_i32 = arith.constant 0 : i32
    %c0_i32_0 = arith.constant 0 : i32
    return %arg0, %c0_i32 : i32, i32
  }
}

module attributes {stable_mosaic.version = 11 : i64} {
  func.func @encoder_layer_kernel(%arg0: i32, %arg1: memref<8x32xf32, #tpu.memory_space<vmem>>, %arg2: memref<32x96xbf16, #tpu.memory_space<vmem>>, %arg3: memref<1x96xf32, #tpu.memory_space<vmem>>, %arg4: memref<32x32xbf16, #tpu.memory_space<vmem>>, %arg5: memref<1x32xf32, #tpu.memory_space<vmem>>, %arg6: memref<1x32xf32, #tpu.memory_space<vmem>>, %arg7: memref<1x32xf32, #tpu.memory_space<vmem>>, %arg8: memref<32x128xbf16, #tpu.memory_space<vmem>>, %arg9: memref<1x128xf32, #tpu.memory_space<vmem>>, %arg10: memref<128x32xbf16, #tpu.memory_space<vmem>>, %arg11: memref<1x32xf32, #tpu.memory_space<vmem>>, %arg12: memref<1x32xf32, #tpu.memory_space<vmem>>, %arg13: memref<1x32xf32, #tpu.memory_space<vmem>>, %arg14: memref<8x32xf32, #tpu.memory_space<vmem>>) attributes {dimension_semantics = [#tpu.dimension_semantics<parallel>], iteration_bounds = array<i64: 2>, scalar_prefetch = 0 : i64, scratch_operands = 0 : i64, tpu.core_type = #tpu.core_type<tc>, window_params = [{transform_indices = @transform_0, window_bounds = array<i64: 8, 32>}, {pipeline_mode = #tpu.pipeline_mode<synchronous>, transform_indices = @transform_1, window_bounds = array<i64: 32, 96>}, {pipeline_mode = #tpu.pipeline_mode<synchronous>, transform_indices = @transform_2, window_bounds = array<i64: 1, 96>}, {pipeline_mode = #tpu.pipeline_mode<synchronous>, transform_indices = @transform_3, window_bounds = array<i64: 32, 32>}, {pipeline_mode = #tpu.pipeline_mode<synchronous>, transform_indices = @transform_4, window_bounds = array<i64: 1, 32>}, {pipeline_mode = #tpu.pipeline_mode<synchronous>, transform_indices = @transform_5, window_bounds = array<i64: 1, 32>}, {pipeline_mode = #tpu.pipeline_mode<synchronous>, transform_indices = @transform_6, window_bounds = array<i64: 1, 32>}, {pipeline_mode = #tpu.pipeline_mode<synchronous>, transform_indices = @transform_7, window_bounds = array<i64: 32, 128>}, {pipeline_mode = #tpu.pipeline_mode<synchronous>, transform_indices = @transform_8, window_bounds = array<i64: 1, 128>}, {pipeline_mode = #tpu.pipeline_mode<synchronous>, transform_indices = @transform_9, window_bounds = array<i64: 128, 32>}, {pipeline_mode = #tpu.pipeline_mode<synchronous>, transform_indices = @transform_10, window_bounds = array<i64: 1, 32>}, {pipeline_mode = #tpu.pipeline_mode<synchronous>, transform_indices = @transform_11, window_bounds = array<i64: 1, 32>}, {pipeline_mode = #tpu.pipeline_mode<synchronous>, transform_indices = @transform_12, window_bounds = array<i64: 1, 32>}, {transform_indices = @transform_13, window_bounds = array<i64: 8, 32>}]} {
    %c0 = arith.constant 0 : index
    %c0_0 = arith.constant 0 : index
    %0 = vector.load %arg1[%c0, %c0_0] : memref<8x32xf32, #tpu.memory_space<vmem>>, vector<8x32xf32>
    %1 = arith.truncf %0 : vector<8x32xf32> to vector<8x32xbf16>
    %c0_1 = arith.constant 0 : index
    %c0_2 = arith.constant 0 : index
    %2 = vector.load %arg2[%c0_1, %c0_2] : memref<32x96xbf16, #tpu.memory_space<vmem>>, vector<32x96xbf16>
    %cst = arith.constant dense<0.000000e+00> : vector<8x96xf32>
    %3 = tpu.matmul %1, %2, %cst {dimension_numbers = #tpu.dot_dimension_numbers<[1], [0], [0], [1], [0, 0, 1, 1], [], []>} : vector<8x32xbf16>, vector<32x96xbf16>, vector<8x96xf32> -> vector<8x96xf32>
    %c0_3 = arith.constant 0 : index
    %c0_4 = arith.constant 0 : index
    %4 = vector.load %arg3[%c0_3, %c0_4] : memref<1x96xf32, #tpu.memory_space<vmem>>, vector<1x96xf32>
    %5 = vector.broadcast %4 : vector<1x96xf32> to vector<8x96xf32>
    %6 = arith.addf %3, %5 : vector<8x96xf32>
    %7 = vector.extract_strided_slice %6 {offsets = [0, 0], sizes = [8, 32], strides = [1, 1]} : vector<8x96xf32> to vector<8x32xf32>
    %cst_5 = arith.constant 0.353553385 : f32
    %8 = vector.broadcast %cst_5 : f32 to vector<8x32xf32>
    %9 = arith.mulf %7, %8 : vector<8x32xf32>
    %10 = vector.extract_strided_slice %6 {offsets = [0, 32], sizes = [8, 32], strides = [1, 1]} : vector<8x96xf32> to vector<8x32xf32>
    %11 = vector.extract_strided_slice %6 {offsets = [0, 64], sizes = [8, 32], strides = [1, 1]} : vector<8x96xf32> to vector<8x32xf32>
    %12 = vector.extract_strided_slice %9 {offsets = [0, 0], sizes = [8, 8], strides = [1, 1]} : vector<8x32xf32> to vector<8x8xf32>
    %13 = vector.shape_cast %12 : vector<8x8xf32> to vector<1x8x8xf32>
    %14 = vector.extract_strided_slice %10 {offsets = [0, 0], sizes = [8, 8], strides = [1, 1]} : vector<8x32xf32> to vector<8x8xf32>
    %15 = vector.shape_cast %14 : vector<8x8xf32> to vector<1x8x8xf32>
    %16 = vector.extract_strided_slice %11 {offsets = [0, 0], sizes = [8, 8], strides = [1, 1]} : vector<8x32xf32> to vector<8x8xf32>
    %17 = vector.shape_cast %16 : vector<8x8xf32> to vector<1x8x8xf32>
    "tpu.trace_start"() <{level = 10 : i32, message = "bqd,bkd->bqk"}> : () -> ()
    %cst_6 = arith.constant dense<0.000000e+00> : vector<1x8x8xf32>
    %18 = tpu.matmul %13, %15, %cst_6 {dimension_numbers = #tpu.dot_dimension_numbers<[2], [2], [1], [1], [0, 0, 0, 1, 1, 1], [0], [0]>} : vector<1x8x8xf32>, vector<1x8x8xf32>, vector<1x8x8xf32> -> vector<1x8x8xf32>
    "tpu.trace_stop"() : () -> ()
    %cst_7 = arith.constant dense<0xFF800000> : vector<1x8xf32>
    %19 = vector.multi_reduction <maximumf>, %18, %cst_7 [2] : vector<1x8x8xf32> to vector<1x8xf32>
    %20 = vector.shape_cast %19 : vector<1x8xf32> to vector<1x8x1xf32>
    %21 = vector.broadcast %20 : vector<1x8x1xf32> to vector<1x8x8xf32>
    %22 = arith.subf %18, %21 : vector<1x8x8xf32>
    %23 = math.exp %22 : vector<1x8x8xf32>
    %cst_8 = arith.constant dense<0.000000e+00> : vector<1x8xf32>
    %24 = vector.multi_reduction <add>, %23, %cst_8 [2] : vector<1x8x8xf32> to vector<1x8xf32>
    %25 = vector.shape_cast %24 : vector<1x8xf32> to vector<1x8x1xf32>
    %26 = tpu.reciprocal %25 {approx = true} : vector<1x8x1xf32> -> vector<1x8x1xf32>
    %27 = vector.broadcast %26 : vector<1x8x1xf32> to vector<1x8x8xf32>
    %28 = arith.mulf %23, %27 : vector<1x8x8xf32>
    "tpu.trace_start"() <{level = 10 : i32, message = "bqk,bkd->bqd"}> : () -> ()
    %cst_9 = arith.constant dense<0.000000e+00> : vector<1x8x8xf32>
    %29 = tpu.matmul %28, %17, %cst_9 {dimension_numbers = #tpu.dot_dimension_numbers<[2], [1], [1], [2], [0, 0, 0, 1, 1, 2], [0], [0]>} : vector<1x8x8xf32>, vector<1x8x8xf32>, vector<1x8x8xf32> -> vector<1x8x8xf32>
    "tpu.trace_stop"() : () -> ()
    %30 = vector.shape_cast %29 : vector<1x8x8xf32> to vector<8x8xf32>
    %31 = vector.extract_strided_slice %9 {offsets = [0, 8], sizes = [8, 8], strides = [1, 1]} : vector<8x32xf32> to vector<8x8xf32>
    %32 = vector.shape_cast %31 : vector<8x8xf32> to vector<1x8x8xf32>
    %33 = vector.extract_strided_slice %10 {offsets = [0, 8], sizes = [8, 8], strides = [1, 1]} : vector<8x32xf32> to vector<8x8xf32>
    %34 = vector.shape_cast %33 : vector<8x8xf32> to vector<1x8x8xf32>
    %35 = vector.extract_strided_slice %11 {offsets = [0, 8], sizes = [8, 8], strides = [1, 1]} : vector<8x32xf32> to vector<8x8xf32>
    %36 = vector.shape_cast %35 : vector<8x8xf32> to vector<1x8x8xf32>
    "tpu.trace_start"() <{level = 10 : i32, message = "bqd,bkd->bqk"}> : () -> ()
    %cst_10 = arith.constant dense<0.000000e+00> : vector<1x8x8xf32>
    %37 = tpu.matmul %32, %34, %cst_10 {dimension_numbers = #tpu.dot_dimension_numbers<[2], [2], [1], [1], [0, 0, 0, 1, 1, 1], [0], [0]>} : vector<1x8x8xf32>, vector<1x8x8xf32>, vector<1x8x8xf32> -> vector<1x8x8xf32>
    "tpu.trace_stop"() : () -> ()
    %cst_11 = arith.constant dense<0xFF800000> : vector<1x8xf32>
    %38 = vector.multi_reduction <maximumf>, %37, %cst_11 [2] : vector<1x8x8xf32> to vector<1x8xf32>
    %39 = vector.shape_cast %38 : vector<1x8xf32> to vector<1x8x1xf32>
    %40 = vector.broadcast %39 : vector<1x8x1xf32> to vector<1x8x8xf32>
    %41 = arith.subf %37, %40 : vector<1x8x8xf32>
    %42 = math.exp %41 : vector<1x8x8xf32>
    %cst_12 = arith.constant dense<0.000000e+00> : vector<1x8xf32>
    %43 = vector.multi_reduction <add>, %42, %cst_12 [2] : vector<1x8x8xf32> to vector<1x8xf32>
    %44 = vector.shape_cast %43 : vector<1x8xf32> to vector<1x8x1xf32>
    %45 = tpu.reciprocal %44 {approx = true} : vector<1x8x1xf32> -> vector<1x8x1xf32>
    %46 = vector.broadcast %45 : vector<1x8x1xf32> to vector<1x8x8xf32>
    %47 = arith.mulf %42, %46 : vector<1x8x8xf32>
    "tpu.trace_start"() <{level = 10 : i32, message = "bqk,bkd->bqd"}> : () -> ()
    %cst_13 = arith.constant dense<0.000000e+00> : vector<1x8x8xf32>
    %48 = tpu.matmul %47, %36, %cst_13 {dimension_numbers = #tpu.dot_dimension_numbers<[2], [1], [1], [2], [0, 0, 0, 1, 1, 2], [0], [0]>} : vector<1x8x8xf32>, vector<1x8x8xf32>, vector<1x8x8xf32> -> vector<1x8x8xf32>
    "tpu.trace_stop"() : () -> ()
    %49 = vector.shape_cast %48 : vector<1x8x8xf32> to vector<8x8xf32>
    %50 = vector.extract_strided_slice %9 {offsets = [0, 16], sizes = [8, 8], strides = [1, 1]} : vector<8x32xf32> to vector<8x8xf32>
    %51 = vector.shape_cast %50 : vector<8x8xf32> to vector<1x8x8xf32>
    %52 = vector.extract_strided_slice %10 {offsets = [0, 16], sizes = [8, 8], strides = [1, 1]} : vector<8x32xf32> to vector<8x8xf32>
    %53 = vector.shape_cast %52 : vector<8x8xf32> to vector<1x8x8xf32>
    %54 = vector.extract_strided_slice %11 {offsets = [0, 16], sizes = [8, 8], strides = [1, 1]} : vector<8x32xf32> to vector<8x8xf32>
    %55 = vector.shape_cast %54 : vector<8x8xf32> to vector<1x8x8xf32>
    "tpu.trace_start"() <{level = 10 : i32, message = "bqd,bkd->bqk"}> : () -> ()
    %cst_14 = arith.constant dense<0.000000e+00> : vector<1x8x8xf32>
    %56 = tpu.matmul %51, %53, %cst_14 {dimension_numbers = #tpu.dot_dimension_numbers<[2], [2], [1], [1], [0, 0, 0, 1, 1, 1], [0], [0]>} : vector<1x8x8xf32>, vector<1x8x8xf32>, vector<1x8x8xf32> -> vector<1x8x8xf32>
    "tpu.trace_stop"() : () -> ()
    %cst_15 = arith.constant dense<0xFF800000> : vector<1x8xf32>
    %57 = vector.multi_reduction <maximumf>, %56, %cst_15 [2] : vector<1x8x8xf32> to vector<1x8xf32>
    %58 = vector.shape_cast %57 : vector<1x8xf32> to vector<1x8x1xf32>
    %59 = vector.broadcast %58 : vector<1x8x1xf32> to vector<1x8x8xf32>
    %60 = arith.subf %56, %59 : vector<1x8x8xf32>
    %61 = math.exp %60 : vector<1x8x8xf32>
    %cst_16 = arith.constant dense<0.000000e+00> : vector<1x8xf32>
    %62 = vector.multi_reduction <add>, %61, %cst_16 [2] : vector<1x8x8xf32> to vector<1x8xf32>
    %63 = vector.shape_cast %62 : vector<1x8xf32> to vector<1x8x1xf32>
    %64 = tpu.reciprocal %63 {approx = true} : vector<1x8x1xf32> -> vector<1x8x1xf32>
    %65 = vector.broadcast %64 : vector<1x8x1xf32> to vector<1x8x8xf32>
    %66 = arith.mulf %61, %65 : vector<1x8x8xf32>
    "tpu.trace_start"() <{level = 10 : i32, message = "bqk,bkd->bqd"}> : () -> ()
    %cst_17 = arith.constant dense<0.000000e+00> : vector<1x8x8xf32>
    %67 = tpu.matmul %66, %55, %cst_17 {dimension_numbers = #tpu.dot_dimension_numbers<[2], [1], [1], [2], [0, 0, 0, 1, 1, 2], [0], [0]>} : vector<1x8x8xf32>, vector<1x8x8xf32>, vector<1x8x8xf32> -> vector<1x8x8xf32>
    "tpu.trace_stop"() : () -> ()
    %68 = vector.shape_cast %67 : vector<1x8x8xf32> to vector<8x8xf32>
    %69 = vector.extract_strided_slice %9 {offsets = [0, 24], sizes = [8, 8], strides = [1, 1]} : vector<8x32xf32> to vector<8x8xf32>
    %70 = vector.shape_cast %69 : vector<8x8xf32> to vector<1x8x8xf32>
    %71 = vector.extract_strided_slice %10 {offsets = [0, 24], sizes = [8, 8], strides = [1, 1]} : vector<8x32xf32> to vector<8x8xf32>
    %72 = vector.shape_cast %71 : vector<8x8xf32> to vector<1x8x8xf32>
    %73 = vector.extract_strided_slice %11 {offsets = [0, 24], sizes = [8, 8], strides = [1, 1]} : vector<8x32xf32> to vector<8x8xf32>
    %74 = vector.shape_cast %73 : vector<8x8xf32> to vector<1x8x8xf32>
    "tpu.trace_start"() <{level = 10 : i32, message = "bqd,bkd->bqk"}> : () -> ()
    %cst_18 = arith.constant dense<0.000000e+00> : vector<1x8x8xf32>
    %75 = tpu.matmul %70, %72, %cst_18 {dimension_numbers = #tpu.dot_dimension_numbers<[2], [2], [1], [1], [0, 0, 0, 1, 1, 1], [0], [0]>} : vector<1x8x8xf32>, vector<1x8x8xf32>, vector<1x8x8xf32> -> vector<1x8x8xf32>
    "tpu.trace_stop"() : () -> ()
    %cst_19 = arith.constant dense<0xFF800000> : vector<1x8xf32>
    %76 = vector.multi_reduction <maximumf>, %75, %cst_19 [2] : vector<1x8x8xf32> to vector<1x8xf32>
    %77 = vector.shape_cast %76 : vector<1x8xf32> to vector<1x8x1xf32>
    %78 = vector.broadcast %77 : vector<1x8x1xf32> to vector<1x8x8xf32>
    %79 = arith.subf %75, %78 : vector<1x8x8xf32>
    %80 = math.exp %79 : vector<1x8x8xf32>
    %cst_20 = arith.constant dense<0.000000e+00> : vector<1x8xf32>
    %81 = vector.multi_reduction <add>, %80, %cst_20 [2] : vector<1x8x8xf32> to vector<1x8xf32>
    %82 = vector.shape_cast %81 : vector<1x8xf32> to vector<1x8x1xf32>
    %83 = tpu.reciprocal %82 {approx = true} : vector<1x8x1xf32> -> vector<1x8x1xf32>
    %84 = vector.broadcast %83 : vector<1x8x1xf32> to vector<1x8x8xf32>
    %85 = arith.mulf %80, %84 : vector<1x8x8xf32>
    "tpu.trace_start"() <{level = 10 : i32, message = "bqk,bkd->bqd"}> : () -> ()
    %cst_21 = arith.constant dense<0.000000e+00> : vector<1x8x8xf32>
    %86 = tpu.matmul %85, %74, %cst_21 {dimension_numbers = #tpu.dot_dimension_numbers<[2], [1], [1], [2], [0, 0, 0, 1, 1, 2], [0], [0]>} : vector<1x8x8xf32>, vector<1x8x8xf32>, vector<1x8x8xf32> -> vector<1x8x8xf32>
    "tpu.trace_stop"() : () -> ()
    %87 = vector.shape_cast %86 : vector<1x8x8xf32> to vector<8x8xf32>
    %88 = tpu.concatenate %30, %49, %68, %87 in 1 : vector<8x8xf32>, vector<8x8xf32>, vector<8x8xf32>, vector<8x8xf32> -> vector<8x32xf32>
    %89 = arith.truncf %88 : vector<8x32xf32> to vector<8x32xbf16>
    %c0_22 = arith.constant 0 : index
    %c0_23 = arith.constant 0 : index
    %90 = vector.load %arg4[%c0_22, %c0_23] : memref<32x32xbf16, #tpu.memory_space<vmem>>, vector<32x32xbf16>
    %cst_24 = arith.constant dense<0.000000e+00> : vector<8x32xf32>
    %91 = tpu.matmul %89, %90, %cst_24 {dimension_numbers = #tpu.dot_dimension_numbers<[1], [0], [0], [1], [0, 0, 1, 1], [], []>} : vector<8x32xbf16>, vector<32x32xbf16>, vector<8x32xf32> -> vector<8x32xf32>
    %c0_25 = arith.constant 0 : index
    %c0_26 = arith.constant 0 : index
    %92 = vector.load %arg5[%c0_25, %c0_26] : memref<1x32xf32, #tpu.memory_space<vmem>>, vector<1x32xf32>
    %93 = vector.broadcast %92 : vector<1x32xf32> to vector<8x32xf32>
    %94 = arith.addf %91, %93 : vector<8x32xf32>
    %95 = arith.addf %0, %94 : vector<8x32xf32>
    %cst_27 = arith.constant dense<0.000000e+00> : vector<8xf32>
    %96 = vector.multi_reduction <add>, %95, %cst_27 [1] : vector<8x32xf32> to vector<8xf32>
    %97 = vector.shape_cast %96 : vector<8xf32> to vector<8x1xf32>
    %cst_28 = arith.constant 3.200000e+01 : f32
    %98 = vector.broadcast %cst_28 : f32 to vector<8x1xf32>
    %99 = arith.divf %97, %98 : vector<8x1xf32>
    %100 = vector.broadcast %99 : vector<8x1xf32> to vector<8x32xf32>
    %101 = arith.subf %95, %100 : vector<8x32xf32>
    %102 = vector.broadcast %99 : vector<8x1xf32> to vector<8x32xf32>
    %103 = arith.subf %95, %102 : vector<8x32xf32>
    %104 = arith.mulf %101, %103 : vector<8x32xf32>
    %cst_29 = arith.constant dense<0.000000e+00> : vector<8xf32>
    %105 = vector.multi_reduction <add>, %104, %cst_29 [1] : vector<8x32xf32> to vector<8xf32>
    %106 = vector.shape_cast %105 : vector<8xf32> to vector<8x1xf32>
    %cst_30 = arith.constant 3.200000e+01 : f32
    %107 = vector.broadcast %cst_30 : f32 to vector<8x1xf32>
    %108 = arith.divf %106, %107 : vector<8x1xf32>
    %109 = vector.broadcast %99 : vector<8x1xf32> to vector<8x32xf32>
    %110 = arith.subf %95, %109 : vector<8x32xf32>
    %cst_31 = arith.constant 9.99999974E-6 : f32
    %111 = vector.broadcast %cst_31 : f32 to vector<8x1xf32>
    %112 = arith.addf %108, %111 : vector<8x1xf32>
    %113 = math.rsqrt %112 : vector<8x1xf32>
    %114 = vector.broadcast %113 : vector<8x1xf32> to vector<8x32xf32>
    %115 = arith.mulf %110, %114 : vector<8x32xf32>
    %c0_32 = arith.constant 0 : index
    %c0_33 = arith.constant 0 : index
    %116 = vector.load %arg6[%c0_32, %c0_33] : memref<1x32xf32, #tpu.memory_space<vmem>>, vector<1x32xf32>
    %117 = vector.broadcast %116 : vector<1x32xf32> to vector<8x32xf32>
    %118 = arith.mulf %115, %117 : vector<8x32xf32>
    %c0_34 = arith.constant 0 : index
    %c0_35 = arith.constant 0 : index
    %119 = vector.load %arg7[%c0_34, %c0_35] : memref<1x32xf32, #tpu.memory_space<vmem>>, vector<1x32xf32>
    %120 = vector.broadcast %119 : vector<1x32xf32> to vector<8x32xf32>
    %121 = arith.addf %118, %120 : vector<8x32xf32>
    %122 = arith.truncf %121 : vector<8x32xf32> to vector<8x32xbf16>
    %c0_36 = arith.constant 0 : index
    %c0_37 = arith.constant 0 : index
    %123 = vector.load %arg8[%c0_36, %c0_37] : memref<32x128xbf16, #tpu.memory_space<vmem>>, vector<32x128xbf16>
    %cst_38 = arith.constant dense<0.000000e+00> : vector<8x128xf32>
    %124 = tpu.matmul %122, %123, %cst_38 {dimension_numbers = #tpu.dot_dimension_numbers<[1], [0], [0], [1], [0, 0, 1, 1], [], []>} : vector<8x32xbf16>, vector<32x128xbf16>, vector<8x128xf32> -> vector<8x128xf32>
    %c0_39 = arith.constant 0 : index
    %c0_40 = arith.constant 0 : index
    %125 = vector.load %arg9[%c0_39, %c0_40] : memref<1x128xf32, #tpu.memory_space<vmem>>, vector<1x128xf32>
    %126 = vector.broadcast %125 : vector<1x128xf32> to vector<8x128xf32>
    %127 = arith.addf %124, %126 : vector<8x128xf32>
    %cst_41 = arith.constant 0.000000e+00 : f32
    %128 = vector.broadcast %cst_41 : f32 to vector<8x128xf32>
    %129 = arith.maximumf %127, %128 : vector<8x128xf32>
    %130 = arith.truncf %129 : vector<8x128xf32> to vector<8x128xbf16>
    %c0_42 = arith.constant 0 : index
    %c0_43 = arith.constant 0 : index
    %131 = vector.load %arg10[%c0_42, %c0_43] : memref<128x32xbf16, #tpu.memory_space<vmem>>, vector<128x32xbf16>
    %cst_44 = arith.constant dense<0.000000e+00> : vector<8x32xf32>
    %132 = tpu.matmul %130, %131, %cst_44 {dimension_numbers = #tpu.dot_dimension_numbers<[1], [0], [0], [1], [0, 0, 1, 1], [], []>} : vector<8x128xbf16>, vector<128x32xbf16>, vector<8x32xf32> -> vector<8x32xf32>
    %c0_45 = arith.constant 0 : index
    %c0_46 = arith.constant 0 : index
    %133 = vector.load %arg11[%c0_45, %c0_46] : memref<1x32xf32, #tpu.memory_space<vmem>>, vector<1x32xf32>
    %134 = vector.broadcast %133 : vector<1x32xf32> to vector<8x32xf32>
    %135 = arith.addf %132, %134 : vector<8x32xf32>
    %136 = arith.addf %121, %135 : vector<8x32xf32>
    %cst_47 = arith.constant dense<0.000000e+00> : vector<8xf32>
    %137 = vector.multi_reduction <add>, %136, %cst_47 [1] : vector<8x32xf32> to vector<8xf32>
    %138 = vector.shape_cast %137 : vector<8xf32> to vector<8x1xf32>
    %cst_48 = arith.constant 3.200000e+01 : f32
    %139 = vector.broadcast %cst_48 : f32 to vector<8x1xf32>
    %140 = arith.divf %138, %139 : vector<8x1xf32>
    %141 = vector.broadcast %140 : vector<8x1xf32> to vector<8x32xf32>
    %142 = arith.subf %136, %141 : vector<8x32xf32>
    %143 = vector.broadcast %140 : vector<8x1xf32> to vector<8x32xf32>
    %144 = arith.subf %136, %143 : vector<8x32xf32>
    %145 = arith.mulf %142, %144 : vector<8x32xf32>
    %cst_49 = arith.constant dense<0.000000e+00> : vector<8xf32>
    %146 = vector.multi_reduction <add>, %145, %cst_49 [1] : vector<8x32xf32> to vector<8xf32>
    %147 = vector.shape_cast %146 : vector<8xf32> to vector<8x1xf32>
    %cst_50 = arith.constant 3.200000e+01 : f32
    %148 = vector.broadcast %cst_50 : f32 to vector<8x1xf32>
    %149 = arith.divf %147, %148 : vector<8x1xf32>
    %150 = vector.broadcast %140 : vector<8x1xf32> to vector<8x32xf32>
    %151 = arith.subf %136, %150 : vector<8x32xf32>
    %cst_51 = arith.constant 9.99999974E-6 : f32
    %152 = vector.broadcast %cst_51 : f32 to vector<8x1xf32>
    %153 = arith.addf %149, %152 : vector<8x1xf32>
    %154 = math.rsqrt %153 : vector<8x1xf32>
    %155 = vector.broadcast %154 : vector<8x1xf32> to vector<8x32xf32>
    %156 = arith.mulf %151, %155 : vector<8x32xf32>
    %c0_52 = arith.constant 0 : index
    %c0_53 = arith.constant 0 : index
    %157 = vector.load %arg12[%c0_52, %c0_53] : memref<1x32xf32, #tpu.memory_space<vmem>>, vector<1x32xf32>
    %158 = vector.broadcast %157 : vector<1x32xf32> to vector<8x32xf32>
    %159 = arith.mulf %156, %158 : vector<8x32xf32>
    %c0_54 = arith.constant 0 : index
    %c0_55 = arith.constant 0 : index
    %160 = vector.load %arg13[%c0_54, %c0_55] : memref<1x32xf32, #tpu.memory_space<vmem>>, vector<1x32xf32>
    %161 = vector.broadcast %160 : vector<1x32xf32> to vector<8x32xf32>
    %162 = arith.addf %159, %161 : vector<8x32xf32>
    %c0_56 = arith.constant 0 : index
    %c0_57 = arith.constant 0 : index
    %163 = vector.load %arg14[%c0_56, %c0_57] : memref<8x32xf32, #tpu.memory_space<vmem>>, vector<8x32xf32>
    tpu.vector_store %arg14[%c0_56, %c0_57], %162 {strides = array<i32>} : memref<8x32xf32, #tpu.memory_space<vmem>>, vector<8x32xf32>,
    return
  }
  func.func @transform_0(%arg0: i32) -> (i32, i32) {
    %c0_i32 = arith.constant 0 : i32
    %c0_i32_0 = arith.constant 0 : i32
    return %arg0, %c0_i32 : i32, i32
  }
  func.func @transform_1(%arg0: i32) -> (i32, i32) {
    %c0_i32 = arith.constant 0 : i32
    %c0_i32_0 = arith.constant 0 : i32
    %c0_i32_1 = arith.constant 0 : i32
    return %c0_i32, %c0_i32_0 : i32, i32
  }
  func.func @transform_2(%arg0: i32) -> (i32, i32) {
    %c0_i32 = arith.constant 0 : i32
    %c0_i32_0 = arith.constant 0 : i32
    %c0_i32_1 = arith.constant 0 : i32
    return %c0_i32, %c0_i32_0 : i32, i32
  }
  func.func @transform_3(%arg0: i32) -> (i32, i32) {
    %c0_i32 = arith.constant 0 : i32
    %c0_i32_0 = arith.constant 0 : i32
    %c0_i32_1 = arith.constant 0 : i32
    return %c0_i32, %c0_i32_0 : i32, i32
  }
  func.func @transform_4(%arg0: i32) -> (i32, i32) {
    %c0_i32 = arith.constant 0 : i32
    %c0_i32_0 = arith.constant 0 : i32
    %c0_i32_1 = arith.constant 0 : i32
    return %c0_i32, %c0_i32_0 : i32, i32
  }
  func.func @transform_5(%arg0: i32) -> (i32, i32) {
    %c0_i32 = arith.constant 0 : i32
    %c0_i32_0 = arith.constant 0 : i32
    %c0_i32_1 = arith.constant 0 : i32
    return %c0_i32, %c0_i32_0 : i32, i32
  }
  func.func @transform_6(%arg0: i32) -> (i32, i32) {
    %c0_i32 = arith.constant 0 : i32
    %c0_i32_0 = arith.constant 0 : i32
    %c0_i32_1 = arith.constant 0 : i32
    return %c0_i32, %c0_i32_0 : i32, i32
  }
  func.func @transform_7(%arg0: i32) -> (i32, i32) {
    %c0_i32 = arith.constant 0 : i32
    %c0_i32_0 = arith.constant 0 : i32
    %c0_i32_1 = arith.constant 0 : i32
    return %c0_i32, %c0_i32_0 : i32, i32
  }
  func.func @transform_8(%arg0: i32) -> (i32, i32) {
    %c0_i32 = arith.constant 0 : i32
    %c0_i32_0 = arith.constant 0 : i32
    %c0_i32_1 = arith.constant 0 : i32
    return %c0_i32, %c0_i32_0 : i32, i32
  }
  func.func @transform_9(%arg0: i32) -> (i32, i32) {
    %c0_i32 = arith.constant 0 : i32
    %c0_i32_0 = arith.constant 0 : i32
    %c0_i32_1 = arith.constant 0 : i32
    return %c0_i32, %c0_i32_0 : i32, i32
  }
  func.func @transform_10(%arg0: i32) -> (i32, i32) {
    %c0_i32 = arith.constant 0 : i32
    %c0_i32_0 = arith.constant 0 : i32
    %c0_i32_1 = arith.constant 0 : i32
    return %c0_i32, %c0_i32_0 : i32, i32
  }
  func.func @transform_11(%arg0: i32) -> (i32, i32) {
    %c0_i32 = arith.constant 0 : i32
    %c0_i32_0 = arith.constant 0 : i32
    %c0_i32_1 = arith.constant 0 : i32
    return %c0_i32, %c0_i32_0 : i32, i32
  }
  func.func @transform_12(%arg0: i32) -> (i32, i32) {
    %c0_i32 = arith.constant 0 : i32
    %c0_i32_0 = arith.constant 0 : i32
    %c0_i32_1 = arith.constant 0 : i32
    return %c0_i32, %c0_i32_0 : i32, i32
  }
  func.func @transform_13(%arg0: i32) -> (i32, i32) {
    %c0_i32 = arith.constant 0 : i32
    %c0_i32_0 = arith.constant 0 : i32
    return %arg0, %c0_i32 : i32, i32
  }
}

</mosaic_0001>

<bundles_post_ra>
// kernel: tpu_custom_call.1
= control target key start
LH: loop header
LB: loop body
LE: loop exit
PB: predicated region body
PF: predicated region fallthrough
CT: control target
= control target key end

     0   :  { %s1594_s0 = inlined_call_operand.vmem [shape: f32[16,32], index: 0, kind: input, shape index: {}]   ;;  %s1595_s1 = inlined_call_operand.vmem [shape: bf16[32,96], index: 1, kind: input, shape index: {}]   ;;  %s1596_s2 = inlined_call_operand.vmem [shape: f32[1,96], index: 2, kind: input, shape index: {}]   ;;  %s1597_s3 = inlined_call_operand.vmem [shape: bf16[32,32], index: 3, kind: input, shape index: {}]   ;;  %s1598_s4 = inlined_call_operand.vmem [shape: f32[1,32], index: 4, kind: input, shape index: {}]   ;;  %s1599_s5 = inlined_call_operand.vmem [shape: f32[1,32], index: 5, kind: input, shape index: {}]   ;;  %s1600_s6 = inlined_call_operand.vmem [shape: f32[1,32], index: 6, kind: input, shape index: {}]   ;;  %s1601_s7 = inlined_call_operand.vmem [shape: bf16[32,128], index: 7, kind: input, shape index: {}]   ;;  %s1602_s8 = inlined_call_operand.vmem [shape: f32[1,128], index: 8, kind: input, shape index: {}]   ;;  %s1603_s9 = inlined_call_operand.vmem [shape: bf16[128,32], index: 9, kind: input, shape index: {}]   ;;  %s1604_s10 = inlined_call_operand.vmem [shape: f32[1,32], index: 10, kind: input, shape index: {}]   ;;  %s1605_s11 = inlined_call_operand.vmem [shape: f32[1,32], index: 11, kind: input, shape index: {}]   ;;  %s1606_s12 = inlined_call_operand.vmem [shape: f32[1,32], index: 12, kind: input, shape index: {}]   ;;  %s1607_s13 = inlined_call_operand.hbm [shape: f32[16,32], index: 13, kind: output, shape index: {}]  }
   0x1   :  { %1608 = sst [smem:[#allocation6_spill]] %s1594_s0 }
   0x2   :  { %1609 = sst [smem:[#allocation7_spill]] %s1595_s1 }
   0x3   :  { %1610 = sst [smem:[#allocation8_spill]] %s1596_s2 }
   0x4   :  { %18 = vsyncpa [#allocation3], 0 }
   0x5   :  { %20 = vsyncpa [#allocation3 + $0x1], 0  ;;  %s1389_s25 = smov 0   ;;  %s1391_s26 = smov 0  }
   0x6   :  { %s1393_s27 = smov 0   ;;  %s1395_s28 = smov 0  }
   0x7 LB: > { %s1410_s29 = sadd.s32 4294967295, %s1302_s28   ;;  %s1061_s30 = sadd.s32 4294967294, %s1302_s28   ;;  %s1302_s28 = sphi %s1395_s28, %s1621_s28   ;;  %s1298_s27 = sphi %s1393_s27, %s1620_s27   ;;  %s1294_s26 = sphi %s1391_s26, %s1619_s26   ;;  %s1290_s25 = sphi %s1389_s25, %s1618_s25  }
   0x8   : > { %s1414_s14 = sadd.s32 1, %s1302_s28   ;;  %s311_s15 = sadd.s32 1, %s1298_s27 }
   0x9   : > { %s308_s16 = ssub.s32 %s1302_s28, %s1414_s14  ;;  %p321_p0 = scmp.ne.s32.totalorder %s1298_s27, %s1294_s26 }
   0xa   : > { %p309_p1 = scmp.eq.s32.totalorder %s308_s16, 0  ;;  %p322_p2 = scmp.eq.s32.totalorder %s1410_s29, 1 }
   0xb   : > { %p327_p3 = scmp.ne.s32.totalorder %s1294_s26, %s1290_s25  ;;  %p328_p4 = scmp.eq.s32.totalorder %s1061_s30, 1 }
   0xc   : > { %s1425_s17 = scalar_select %p309_p1, %s1298_s27, %s311_s15  }
   0xd   : > { %p1427_p5 = por %p322_p2, %p321_p0  ;;  %p1431_p6 = por %p328_p4, %p327_p3 }
   0xe   : > { %1611 = sst [smem:[#allocation5_spill]] %s1425_s17  ;;  %p1064_p7 = scmp.ge.s32.totalorder %s1302_s28, 1 }
   0xf   : > { %p389_p8 = scmp.lt.s32.totalorder %s1302_s28, 3 }
  0x11   : > { %p390_p9 = pnand %p1064_p7, %p389_p8 }
  0x12   : > { %s1614_s1 = sld [smem:[#allocation7_spill]] (!%p390_p9)  ;;  %p432_p10 = scmp.lt.s32.totalorder (!%p390_p9), %s1410_s29, 1 }
  0x13   : > { %393 = sbr.rel (%p390_p9) target bundleno = 2261 (0x8d5), region = 72  ;;  %s1615_s0 = sld [smem:[#allocation6_spill]] (!%p390_p9) }
  0x14   : > { %s1616_s2 = sld [smem:[#allocation8_spill]] (!%p390_p9)  ;;  %s1304_s22 = smov (!%p390_p9), 88  }
  0x15   : > { %s1305_s23 = smov (!%p390_p9), 96   ;;  %s1309_s15 = smov (!%p390_p9), 112  }
  0x16   : > { %s1310_s16 = smov (!%p390_p9), 72   ;;  %s1311_s20 = smov (!%p390_p9), 104  }
  0x17   : > { %s1312_s21 = smov (!%p390_p9), 48  }
  0x18   : > { %v1143_v0 = vld [vmem:[%s1614_s1 + $0x8] sm:$0xff]  ;;  %v1142_v1 = vld [vmem:[%s1614_s1] sm:$0xff]  ;;  %s433_s24 = scalar_select %p432_p10, %s1410_s29, 1  ;;  %vm459_vm0 = vcmask 261120   ;;  %vm480_vm1 = vcmask 64512   ;;  %vm751_vm2 = vcmask 130048  }
  0x19   : > { %469 = vmatpush.bf16.msra.mxu0 %v1143_v0  ;;  %v1145_v0 = vld [vmem:[%s1597_s3 + $0x8] sm:$0xff]  ;;  %vm753_vm3 = vcmask 195584  }
  0x1a   : > { %s1066_s30 = sshll.u32 %s433_s24, 3  ;;  %v1210_v4 = vld [vmem:[%s1616_s2] ss:$0 sm:$0xff]  ;;  %s1307_s24 = smov 64  }
  0x1b   : > { %s435_s17 = scalar_lea.vmem %s1615_s0, %s1066_s30  ;;  %s1308_s30 = smov 80  }
  0x1c   : > { %v1448_v2 = vld [vmem:[%s435_s17] sm:$0xff]  ;;  %s1306_s17 = smov 120  }
  0x1d   : > { %470 = vmatpush.bf16.msra.mxu0 %v1142_v1  ;;  %v438_v3 = vpack.c.bf16 %v1448_v2, %v1448_v2  ;;  %v1144_v1 = vld [vmem:[%s1597_s3] sm:$0xff] }
  0x20   : > { %1075 = vmatmul.msk.bf16.vlgmr.msra.gmra.mxu0 %vm459_vm0, %v438_v3 }
  0x9d   : > { %v472_v5 = vpop.f32.mrf.mxu0 }
  0x9e   : > { %v1456_v6 = vadd.f32 %v1210_v4, %v472_v5 }
  0xa0   : > { %545 = vrot.lane.b32.xlu1 %v1456_v6, %s1304_s22  ;;  %478 = vrot.lane.b32.xlu0 %v1456_v6, %s1305_s23  ;;  %v476_v7 = vmul.f32 0.35355338, %v1456_v6  ;;  %s1313_s22 = smov 56   ;;  %s1314_s23 = smov 40  }
  0xa2   : > { %543 = vrot.lane.b32.xlu2 %v476_v7, %s1306_s17  ;;  %s1315_s17 = smov 24  }
  0xa5   : > { %v474_v8 = vpop.f32.mrf.mxu0 }
  0xaa   : > { %517 = vrot.lane.b32.xlu2 %v1456_v6, %s1307_s24  ;;  %s1316_s24 = smov 8  }
  0xb2   : > { %610 = vrot.lane.b32.xlu2 %v1456_v6, %s1308_s30  ;;  %s1317_s30 = smov 16  }
  0xba   : > { %608 = vrot.lane.b32.xlu2 %v476_v7, %s1309_s15  ;;  %s1139_s15 = sshll.u32 %s1410_s29, 3 }
  0xc2   : > { %675 = vrot.lane.b32.xlu2 %v1456_v6, %s1310_s16 }
  0xfc   : > { %v544_v9 = vpop.permute.xlu2 %543 }
 0x104   : > { %v518_v10 = vpop.permute.xlu2 %517 }
 0x10c   : > { %v611_v13 = vpop.permute.xlu2 %610 }
 0x112   : > { %v546_v11 = vpop.permute.xlu1 %545  ;;  %v479_v12 = vpop.permute.xlu0 %478 }
 0x113   : > { %1076 = vmatpush.xpose.msk.msra.mxu1 %vm480_vm1, %v479_v12  ;;  %1079 = vmatpush.xpose.msk.msra.mxu3 %vm480_vm1, %v546_v11 }
 0x114   : > { %v609_v18 = vpop.permute.xlu2 %608 }
 0x116   : > { %1077 = vmatmul.msk.f32.vlgmr.msra.gmra.mxu1 %vm480_vm1, %v476_v7  ;;  %1080 = vmatmul.msk.f32.vlgmr.msra.gmra.mxu3 %vm480_vm1, %v544_v9 }
 0x117   : > { %538 = vmatpush.msrb.mxu1 %v518_v10  ;;  %v1211_v10 = vld [vmem:[%s1598_s4] ss:$0 sm:$0xff] }
 0x119   : > { %1082 = vmatpush.xpose.msk.msra.mxu1 %vm480_vm1, %v611_v13 }
 0x11c   : > { %v676_v19 = vpop.permute.xlu2 %675 }
 0x193   : > { %v503_v14 = vpop.f32.mrf.mxu1 }
 0x194   : > { %v506_v15 = vsel %vm480_vm1, %v503_v14, -inf }
 0x195   : > { %507 = vmax.xlane.f32.xlu0 %v506_v15 }
 0x199   : > { %v568_v16 = vpop.f32.mrf.mxu3 }
 0x19a   : > { %v571_v17 = vsel %vm480_vm1, %v568_v16, -inf }
 0x19b   : > { %572 = vmax.xlane.f32.xlu2 %v571_v17 }
 0x208   : > { %v508_v20 = vpop.xlane.xlu0 %507 }
 0x209   : > { %v509_v21 = vsub.f32 %v503_v14, %v508_v20 }
 0x20b   : > { %v510_v22 = vmul.f32 1.442695, %v509_v21 }
 0x20d   : > { %1218 = vpow2.f32 %v510_v22 }
 0x20e   : > { %v573_v23 = vpop.xlane.xlu2 %572 }
 0x20f   : > { %v574_v24 = vsub.f32 %v568_v16, %v573_v23  ;;  %v1318_v16 = vmov 32.0  }
 0x211   : > { %v575_v25 = vmul.f32 1.442695, %v574_v24 }
 0x213   : > { %v1219_v26 = vpop.eup %1218  ;;  %1220 = vpow2.f32 %v575_v25 }
 0x214   : > { %v512_v27 = vsel %vm480_vm1, %v1219_v26, 0.0 }
 0x215   : > { %513 = vadd.xlane.f32.xlu1 %v512_v27  ;;  %v1147_v27 = vld [vmem:[%s1601_s7 + $0x8] sm:$0xff] }
 0x216   : > { %862 = vmatpush.bf16.msrb.mxu0 %v1147_v27 }
 0x219   : > { %v1221_v28 = vpop.eup %1220 }
 0x21a   : > { %v577_v29 = vsel %vm480_vm1, %v1221_v28, 0.0 }
 0x21b   : > { %578 = vadd.xlane.f32.xlu0 %v577_v29  ;;  %v1155_v29 = vld [vmem:[%s1603_s9 + $0x38] sm:$0xff] }
 0x21c   : > { %939 = vmatpush.bf16.msra.mxu2 %v1155_v29 }
 0x22e   : > { %673 = vrot.lane.b32.xlu1 %v476_v7, %s1311_s20 }
 0x288   : > { %v514_v30 = vpop.xlane.xlu1 %513 }
 0x289   : > { %1222 = vrcp.f32 %v514_v30 }
 0x28e   : > { %v579_v39 = vpop.xlane.xlu0 %578 }
 0x28f   : > { %v1223_v31 = vpop.eup %1222 }
 0x290   : > { %v516_v32 = vmul.f32 %v1223_v31, %v1219_v26 }
 0x292   : > { %1078 = vmatmul.msk.f32.vlgmr.msrb.gmra.mxu1 %vm480_vm1, %v516_v32  ;;  %v1154_v32 = vld [vmem:[%s1603_s9 + $0x30] sm:$0xff] }
 0x293   : > { %1085 = vmatpush.xpose.msk.msrb.mxu1 %vm480_vm1, %v676_v19  ;;  %940 = vmatpush.bf16.msra.mxu2 %v1154_v32 }
 0x29a   : > { %1083 = vmatmul.msk.f32.vlgmr.msra.gmra.mxu1 %vm480_vm1, %v609_v18 }
 0x2a0   : > { %v674_v33 = vpop.permute.xlu1 %673 }
 0x2a2   : > { %1086 = vmatmul.msk.f32.vlgmr.msrb.gmra.mxu1 %vm480_vm1, %v674_v33 }
 0x30f   : > { %v1477_v34 = vpop.f32.mrf.mxu1 }
 0x317   : > { %v633_v35 = vpop.f32.mrf.mxu1 }
 0x318   : > { %v636_v36 = vsel %vm480_vm1, %v633_v35, -inf }
 0x319   : > { %637 = vmax.xlane.f32.xlu1 %v636_v36 }
 0x31f   : > { %v698_v37 = vpop.f32.mrf.mxu1 }
 0x320   : > { %v701_v38 = vsel %vm480_vm1, %v698_v37, -inf }
 0x321   : > { %702 = vmax.xlane.f32.xlu0 %v701_v38  ;;  %v1151_v38 = vld [vmem:[%s1603_s9 + $0x18] sm:$0xff] }
 0x332   : > { %647 = vrot.lane.b32.xlu1 %v1456_v6, %s1312_s21 }
 0x38c   : > { %v638_v40 = vpop.xlane.xlu1 %637 }
 0x38d   : > { %v639_v41 = vsub.f32 %v633_v35, %v638_v40  ;;  %v1152_v35 = vld [vmem:[%s1603_s9 + $0x20] sm:$0xff] }
 0x38f   : > { %v640_v42 = vmul.f32 1.442695, %v639_v41  ;;  %v1150_v41 = vld [vmem:[%s1603_s9 + $0x10] sm:$0xff] }
 0x391   : > { %1224 = vpow2.f32 %v640_v42 }
 0x394   : > { %v703_v43 = vpop.xlane.xlu0 %702 }
 0x395   : > { %v704_v44 = vsub.f32 %v698_v37, %v703_v43 }
 0x397   : > { %v1225_v45 = vpop.eup %1224  ;;  %v705_v46 = vmul.f32 1.442695, %v704_v44  ;;  %v1212_v44 = vld [vmem:[%s1599_s5] ss:$0 sm:$0xff] }
 0x398   : > { %v642_v47 = vsel %vm480_vm1, %v1225_v45, 0.0 }
 0x399   : > { %1226 = vpow2.f32 %v705_v46  ;;  %643 = vadd.xlane.f32.xlu0 %v642_v47  ;;  %v1213_v47 = vld [vmem:[%s1600_s6] ss:$0 sm:$0xff] }
 0x39f   : > { %v1227_v48 = vpop.eup %1226 }
 0x3a0   : > { %v707_v49 = vsel %vm480_vm1, %v1227_v48, 0.0 }
 0x3a1   : > { %708 = vadd.xlane.f32.xlu2 %v707_v49 }
 0x3a4   : > { %v648_v58 = vpop.permute.xlu1 %647 }
 0x3ad   : > { %582 = vrot.lane.b32.xlu0 %v1456_v6, %s1313_s22 }
 0x3b9   : > { %712 = vrot.lane.b32.xlu2 %v1456_v6, %s1314_s23  ;;  %s997_s23 = scalar_lea.hbm %s1607_s13, %s1139_s15 }
 0x3ba   : > { %s1001_s2 = sshll.u32 %s997_s23, 4  ;;  %s1002_s2 = int_to_ptr.hbm [resolvable:$true] %s1001_s2 }
 0x3bb   : > { %s1254_s20 = sshra.s32 %s1002_s2, 4  ;;  %s1255_s20 = int_to_ptr.hbm [resolvable:$true] %s1254_s20 }
 0x3bc   : > { %s1256_s15 = scalar_lea.hbm %s1255_s20, 8  ;;  %p1261_p0 = scmp.lt.s32.totalorder %s1255_s20, %s1607_s13 }
 0x3bd   : > { %p1257_p11 = scmp.ne.s32.totalorder %s1255_s20, %s1256_s15 }
 0x3bf   : > { %p1258_p12 = pnand %p1257_p11, %p1427_p5 }
 0x3c1   : > { %p1259_p13 = pneg %p1258_p12 }
 0x40c   : > { %v644_v51 = vpop.xlane.xlu0 %643 }
 0x414   : > { %v709_v50 = vpop.xlane.xlu2 %708 }
 0x415   : > { %1228 = vrcp.f32 %v709_v50 }
 0x416   : > { %1230 = vrcp.f32 %v579_v39 }
 0x417   : > { %1232 = vrcp.f32 %v644_v51  ;;  %v1149_v51 = vld [vmem:[%s1603_s9 + $0x8] sm:$0xff] }
 0x418   : > { %1234 = vrcp.f32 %v1318_v16  ;;  %v1216_v16 = vld [vmem:[%s1605_s11] ss:$0 sm:$0xff] }
 0x41b   : > { %v1229_v52 = vpop.eup %1228 }
 0x41c   : > { %v1231_v53 = vpop.eup %1230  ;;  %v711_v54 = vmul.f32 %v1229_v52, %v1227_v48  ;;  %v713_v55 = vpop.permute.xlu2 %712  ;;  %v1148_v52 = vld [vmem:[%s1603_s9] sm:$0xff] }
 0x41d   : > { %733 = vmatpush.msra.mxu1 %v713_v55  ;;  %v581_v57 = vmul.f32 %v1231_v53, %v1221_v28  ;;  %v1233_v59 = vpop.eup %1232  ;;  %v1146_v28 = vld [vmem:[%s1601_s7] sm:$0xff] }
 0x41e   : > { %1087 = vmatmul.msk.f32.vlgmr.msra.gmra.mxu1 %vm480_vm1, %v711_v54  ;;  %v646_v60 = vmul.f32 %v1233_v59, %v1225_v45  ;;  %v1235_v17 = vpop.eup %1234  ;;  %863 = vmatpush.bf16.msrb.mxu0 %v1146_v28  ;;  %v1214_v53 = vld [vmem:[%s1602_s8] ss:$0 sm:$0xff] }
 0x41f   : > { %v583_v56 = vpop.permute.xlu0 %582  ;;  %v797_v18 = vmul.f32 32.0, %v1235_v17  ;;  %vm801_vm4 = vweird.f32 %v1235_v17  ;;  %v1215_v59 = vld [vmem:[%s1604_s10] ss:$0 sm:$0xff] }
 0x420   : > { %603 = vmatpush.msrb.mxu3 %v583_v56 }
 0x421   : > { %1081 = vmatmul.msk.f32.vlgmr.msrb.gmra.mxu3 %vm480_vm1, %v581_v57  ;;  %v798_v19 = vsub.f32 1.0, %v797_v18 }
 0x422   : > { %668 = vmatpush.msra.mxu3 %v648_v58 }
 0x423   : > { %v799_v20 = vmul.f32 %v1235_v17, %v798_v19  ;;  %v1217_v19 = vld [vmem:[%s1606_s12] ss:$0 sm:$0xff] }
 0x424   : > { %785 = vmatpush.bf16.msrb.mxu3 %v1145_v0 }
 0x425   : > { %v800_v21 = vadd.f32 %v1235_v17, %v799_v20 }
 0x427   : > { %v1503_v22 = vsel %vm801_vm4, %v1235_v17, %v800_v21 }
 0x428   : > { %786 = vmatpush.bf16.msrb.mxu3 %v1144_v1 }
 0x429   : > { %1084 = vmatmul.msk.f32.vlgmr.msra.gmra.mxu3 %vm480_vm1, %v646_v60 }
 0x49b   : > { %v735_v61 = vpop.f32.mrf.mxu1 }
 0x49c   : > { %747 = vrot.lane.b32.xlu1 %v735_v61, %s1315_s17 }
 0x4a4   : > { %v605_v62 = vpop.f32.mrf.mxu3 }
 0x4a5   : > { %739 = vrot.lane.b32.xlu0 %v605_v62, %s1316_s24  ;;  %s429_s24 = sand.u32 1, %s1294_s26  }
 0x4a6   : > { %s987_s16 = scalar_lea.sflag [#allocation3], %s429_s24 }
 0x4ac   : > { %v670_v63 = vpop.f32.mrf.mxu3 }
 0x4ad   : > { %743 = vrot.lane.b32.xlu0 %v670_v63, %s1317_s30  ;;  %s1065_s30 = sshll.u32 %s429_s24, 3 }
 0x4ae   : > { %s431_s1 = scalar_lea.vmem [#allocation2], %s1065_s30  ;;  %s1260_s30 = scalar_lea.hbm %s1607_s13, 16 }
 0x4af   : > { %s999_s29 = sshll.u32 %s431_s1, 4  ;;  %p1262_p1 = scmp.lt.s32.totalorder %s1260_s30, %s1256_s15  ;;  %s1000_s29 = int_to_ptr.vmem [resolvable:$true] %s999_s29 }
 0x4b1   : > { %p1263_p2 = por %p1262_p1, %p1261_p0 }
 0x4b3   : > { %p1264_p3 = pnand %p1263_p2, %p1259_p13 }
 0x50e   : > { %v748_v6 = vpop.permute.xlu1 %747 }
 0x517   : > { %v740_v3 = vpop.permute.xlu0 %739 }
 0x518   : > { %v750_v4 = vsel %vm480_vm1, %v1477_v34, %v740_v3  ;;  %v1153_v34 = vld [vmem:[%s1603_s9 + $0x28] sm:$0xff] }
 0x519   : > { %941 = vmatpush.bf16.msra.mxu2 %v1153_v34 }
 0x51d   : > { %942 = vmatpush.bf16.msra.mxu2 %v1152_v35 }
 0x51f   : > { %v744_v5 = vpop.permute.xlu0 %743 }
 0x520   : > { %v752_v7 = vsel %vm751_vm2, %v750_v4, %v744_v5 }
 0x521   : > { %v754_v8 = vsel %vm753_vm3, %v752_v7, %v748_v6  ;;  %943 = vmatpush.bf16.msra.mxu2 %v1151_v38 }
 0x522   : > { %v755_v9 = vpack.c.bf16 %v754_v8, %v754_v8 }
 0x524   : > { %1096 = vmatmul.msk.bf16.vlgmr.msrb.gmra.mxu3 %vm459_vm0, %v755_v9 }
 0x525   : > { %944 = vmatpush.bf16.msra.mxu2 %v1150_v41 }
 0x529   : > { %945 = vmatpush.bf16.msra.mxu2 %v1149_v51 }
 0x52d   : > { %946 = vmatpush.bf16.msra.mxu2 %v1148_v52 }
 0x5a7   : > { %v788_v11 = vpop.f32.mrf.mxu3 }
 0x5a8   : > { %v789_v12 = vadd.f32 %v1211_v10, %v788_v11 }
 0x5aa   : > { %v792_v13 = vadd.f32 %v789_v12, %v1448_v2 }
 0x5ac   : > { %v793_v14 = vsel %vm459_vm0, %v792_v13, 0.0 }
 0x5ad   : > { %794 = vadd.xlane.f32.xlu0 %v793_v14 }
 0x5af   : > { %v790_v15 = vpop.f32.mrf.mxu3 }
 0x620   : > { %v795_v23 = vpop.xlane.xlu0 %794 }
 0x621   : > { %v803_v24 = vmul.f32 %v1503_v22, %v795_v23 }
 0x623   : > { %v804_v25 = vsub.f32 %v792_v13, %v803_v24 }
 0x625   : > { %v805_v26 = vmul.f32 %v804_v25, %v804_v25 }
 0x627   : > { %v806_v2 = vsel %vm459_vm0, %v805_v26, 0.0 }
 0x628   : > { %807 = vadd.xlane.f32.xlu2 %v806_v2 }
 0x69b   : > { %v808_v30 = vpop.xlane.xlu2 %807 }
 0x69c   : > { %v809_v31 = vmul.f32 %v808_v30, %v1503_v22 }
 0x69e   : > { %v810_v33 = vadd.f32 1e-05, %v809_v31 }
 0x6a0   : > { %1236 = vrsqrt.f32 %v810_v33  ;;  %vm817_vm6 = vweird.f32 %v810_v33 }
 0x6a6   : > { %v1237_v36 = vpop.eup %1236 }
 0x6a7   : > { %v812_v37 = vmul.f32 %v1237_v36, %v810_v33  ;;  %vm818_vm5 = vweird.f32 %v1237_v36 }
 0x6a8   : > { %vm819_vm7 = vmor %vm817_vm6, %vm818_vm5 }
 0x6a9   : > { %v813_v39 = vmul.f32 %v1237_v36, %v812_v37 }
 0x6ab   : > { %v814_v40 = vmul.f32 0.5, %v813_v39 }
 0x6ad   : > { %v815_v42 = vsub.f32 1.5, %v814_v40 }
 0x6af   : > { %v816_v43 = vmul.f32 %v1237_v36, %v815_v42 }
 0x6b1   : > { %v820_v45 = vsel %vm819_vm7, %v1237_v36, %v816_v43 }
 0x6b2   : > { %v821_v46 = vmul.f32 %v820_v45, %v804_v25 }
 0x6b4   : > { %v826_v48 = vmul.f32 %v1212_v44, %v821_v46 }
 0x6b6   : > { %v831_v49 = vadd.f32 %v1213_v47, %v826_v48 }
 0x6b8   : > { %v832_v50 = vpack.c.bf16 %v831_v49, %v831_v49 }
 0x6ba   : > { %1105 = vmatmul.msk.bf16.vlgmr.msrb.gmra.mxu0 %vm459_vm0, %v832_v50 }
 0x737   : > { %v865_v54 = vpop.f32.mrf.mxu0 }
 0x738   : > { %v866_v55 = vadd.f32 %v1214_v53, %v865_v54 }
 0x73a   : > { %v869_v56 = vmax.f32 %v866_v55, 0.0 }
 0x73c   : > { %v870_v57 = vpack.c.bf16 %v869_v56, %v869_v56 }
 0x73e   : > { %947 = vmatmul.bf16.vlgmr.msra.gmra.mxu2 %v870_v57 }
 0x73f   : > { %v867_v58 = vpop.f32.mrf.mxu0 }
 0x7c1   : > { %v948_v60 = vpop.f32.mrf.mxu2 }
 0x7c2   : > { %v949_v61 = vadd.f32 %v1215_v59, %v948_v60 }
 0x7c4   : > { %v952_v62 = vadd.f32 %v949_v61, %v831_v49 }
 0x7c6   : > { %v953_v63 = vsel %vm459_vm0, %v952_v62, 0.0 }
 0x7c7   : > { %954 = vadd.xlane.f32.xlu1 %v953_v63 }
 0x7c9   : > { %v950_v0 = vpop.f32.mrf.mxu2 }
 0x83a   : > { %v955_v1 = vpop.xlane.xlu1 %954 }
 0x83b   : > { %v956_v3 = vmul.f32 %v955_v1, %v1503_v22 }
 0x83d   : > { %v957_v4 = vsub.f32 %v952_v62, %v956_v3 }
 0x83f   : > { %v958_v5 = vmul.f32 %v957_v4, %v957_v4 }
 0x841   : > { %v959_v6 = vsel %vm459_vm0, %v958_v5, 0.0 }
 0x842   : > { %960 = vadd.xlane.f32.xlu0 %v959_v6 }
 0x8b5   : > { %v961_v7 = vpop.xlane.xlu0 %960 }
 0x8b6   : > { %v962_v8 = vmul.f32 %v961_v7, %v1503_v22 }
 0x8b8   : > { %v963_v9 = vadd.f32 1e-05, %v962_v8 }
 0x8ba   : > { %1238 = vrsqrt.f32 %v963_v9  ;;  %vm970_vm9 = vweird.f32 %v963_v9 }
 0x8c0   : > { %v1239_v10 = vpop.eup %1238 }
 0x8c1   : > { %v965_v11 = vmul.f32 %v1239_v10, %v963_v9  ;;  %vm971_vm8 = vweird.f32 %v1239_v10 }
 0x8c2   : > { %vm972_vm10 = vmor %vm970_vm9, %vm971_vm8 }
 0x8c3   : > { %v966_v12 = vmul.f32 %v1239_v10, %v965_v11 }
 0x8c5   : > { %v967_v13 = vmul.f32 0.5, %v966_v12 }
 0x8c7   : > { %v968_v14 = vsub.f32 1.5, %v967_v13 }
 0x8c9   : > { %v969_v15 = vmul.f32 %v1239_v10, %v968_v14 }
 0x8cb   : > { %v973_v17 = vsel %vm972_vm10, %v1239_v10, %v969_v15 }
 0x8cc   : > { %v974_v18 = vmul.f32 %v973_v17, %v957_v4 }
 0x8ce   : > { %v979_v20 = vmul.f32 %v1216_v16, %v974_v18 }
 0x8d0   : > { %v984_v21 = vadd.f32 %v1217_v19, %v979_v20 }
 0x8d2   : > { %985 = vst.msk [vmem:[%s431_s1] sm:$0xff] %vm459_vm0, %v984_v21 }
 0x8d3   : > { %1267 = shalt.err (!%p1264_p3)
}
 0x8d4   : > { %1156 = dma.vmem_to_hbm [thread:$0]  (%p1427_p5), %s1000_s29, 128, %s1002_s2, %s987_s16  }
 0x8d5 PF: > { %p1162_p4 = scmp.ge.s32.totalorder %s1302_s28, 2  ;;  %s1013_s1 = sand.u32 1, %s1290_s25  }
 0x8d6   : > { %s1014_s24 = scalar_lea.sflag [#allocation3], %s1013_s1 }
 0x8d7   : > { %p1159_p7 = pnand %p1162_p4, %p1431_p6 }
 0x8d9   : > { %p1160_p8 = pneg %p1159_p7 }
 0x8db   : > { %1285 = dma.done.wait (%p1160_p8), %s1014_s24, 128  }
 0x8dc   : > { %1287 = vsyncadd (%p1160_p8), %s1014_s24, 4294967168  ;;  %s1617_s17 = sld [smem:[#allocation5_spill]]  ;;  %p23_p9 = scmp.ge.s32.totalorder %s1414_s14, 4  }
 0x8dd   : > { %s1618_s25 = smov %s1294_s26  ;;  %s1619_s26 = smov %s1298_s27 }
 0x8de   : > { %s1621_s28 = smov %s1414_s14  ;;  %25 = sbr.rel (!%p23_p9) target bundleno = 7 (0x7), region = 107 }
 0x8e2   : > { %s1620_s27 = smov %s1617_s17 }
 0x8e3   :  { %1020 = vsyncpa [#allocation3], 1 }
 0x8e4   :  { %1022 = vsyncpa [#allocation3 + $0x1], 1 }

// kernel: tpu_custom_call.1
= control target key start
LH: loop header
LB: loop body
LE: loop exit
PB: predicated region body
PF: predicated region fallthrough
CT: control target
= control target key end

     0   :  { %s1594_s0 = inlined_call_operand.vmem [shape: f32[16,32], index: 0, kind: input, shape index: {}]   ;;  %s1595_s1 = inlined_call_operand.vmem [shape: bf16[32,96], index: 1, kind: input, shape index: {}]   ;;  %s1596_s2 = inlined_call_operand.vmem [shape: f32[1,96], index: 2, kind: input, shape index: {}]   ;;  %s1597_s3 = inlined_call_operand.vmem [shape: bf16[32,32], index: 3, kind: input, shape index: {}]   ;;  %s1598_s4 = inlined_call_operand.vmem [shape: f32[1,32], index: 4, kind: input, shape index: {}]   ;;  %s1599_s5 = inlined_call_operand.vmem [shape: f32[1,32], index: 5, kind: input, shape index: {}]   ;;  %s1600_s6 = inlined_call_operand.vmem [shape: f32[1,32], index: 6, kind: input, shape index: {}]   ;;  %s1601_s7 = inlined_call_operand.vmem [shape: bf16[32,128], index: 7, kind: input, shape index: {}]   ;;  %s1602_s8 = inlined_call_operand.vmem [shape: f32[1,128], index: 8, kind: input, shape index: {}]   ;;  %s1603_s9 = inlined_call_operand.vmem [shape: bf16[128,32], index: 9, kind: input, shape index: {}]   ;;  %s1604_s10 = inlined_call_operand.vmem [shape: f32[1,32], index: 10, kind: input, shape index: {}]   ;;  %s1605_s11 = inlined_call_operand.vmem [shape: f32[1,32], index: 11, kind: input, shape index: {}]   ;;  %s1606_s12 = inlined_call_operand.vmem [shape: f32[1,32], index: 12, kind: input, shape index: {}]   ;;  %s1607_s13 = inlined_call_operand.hbm [shape: f32[16,32], index: 13, kind: output, shape index: {}]  }
   0x1   :  { %1608 = sst [smem:[#allocation6_spill]] %s1594_s0 }
   0x2   :  { %1609 = sst [smem:[#allocation7_spill]] %s1595_s1 }
   0x3   :  { %1610 = sst [smem:[#allocation8_spill]] %s1596_s2 }
   0x4   :  { %18 = vsyncpa [#allocation3], 0 }
   0x5   :  { %20 = vsyncpa [#allocation3 + $0x1], 0  ;;  %s1389_s25 = smov 0   ;;  %s1391_s26 = smov 0  }
   0x6   :  { %s1393_s27 = smov 0   ;;  %s1395_s28 = smov 0  }
   0x7 LB: > { %s1410_s29 = sadd.s32 4294967295, %s1302_s28   ;;  %s1061_s30 = sadd.s32 4294967294, %s1302_s28   ;;  %s1302_s28 = sphi %s1395_s28, %s1621_s28   ;;  %s1298_s27 = sphi %s1393_s27, %s1620_s27   ;;  %s1294_s26 = sphi %s1391_s26, %s1619_s26   ;;  %s1290_s25 = sphi %s1389_s25, %s1618_s25  }
   0x8   : > { %s1414_s14 = sadd.s32 1, %s1302_s28   ;;  %s311_s15 = sadd.s32 1, %s1298_s27 }
   0x9   : > { %s308_s16 = ssub.s32 %s1302_s28, %s1414_s14  ;;  %p321_p0 = scmp.ne.s32.totalorder %s1298_s27, %s1294_s26 }
   0xa   : > { %p309_p1 = scmp.eq.s32.totalorder %s308_s16, 0  ;;  %p322_p2 = scmp.eq.s32.totalorder %s1410_s29, 1 }
   0xb   : > { %p327_p3 = scmp.ne.s32.totalorder %s1294_s26, %s1290_s25  ;;  %p328_p4 = scmp.eq.s32.totalorder %s1061_s30, 1 }
   0xc   : > { %s1425_s17 = scalar_select %p309_p1, %s1298_s27, %s311_s15  }
   0xd   : > { %p1427_p5 = por %p322_p2, %p321_p0  ;;  %p1431_p6 = por %p328_p4, %p327_p3 }
   0xe   : > { %1611 = sst [smem:[#allocation5_spill]] %s1425_s17  ;;  %p1064_p7 = scmp.ge.s32.totalorder %s1302_s28, 1 }
   0xf   : > { %p389_p8 = scmp.lt.s32.totalorder %s1302_s28, 3 }
  0x11   : > { %p390_p9 = pnand %p1064_p7, %p389_p8 }
  0x12   : > { %s1614_s1 = sld [smem:[#allocation7_spill]] (!%p390_p9)  ;;  %p432_p10 = scmp.lt.s32.totalorder (!%p390_p9), %s1410_s29, 1 }
  0x13   : > { %393 = sbr.rel (%p390_p9) target bundleno = 2261 (0x8d5), region = 72  ;;  %s1615_s0 = sld [smem:[#allocation6_spill]] (!%p390_p9) }
  0x14   : > { %s1616_s2 = sld [smem:[#allocation8_spill]] (!%p390_p9)  ;;  %s1304_s22 = smov (!%p390_p9), 88  }
  0x15   : > { %s1305_s23 = smov (!%p390_p9), 96   ;;  %s1309_s15 = smov (!%p390_p9), 112  }
  0x16   : > { %s1310_s16 = smov (!%p390_p9), 72   ;;  %s1311_s20 = smov (!%p390_p9), 104  }
  0x17   : > { %s1312_s21 = smov (!%p390_p9), 48  }
  0x18   : > { %v1143_v0 = vld [vmem:[%s1614_s1 + $0x8] sm:$0xff]  ;;  %v1142_v1 = vld [vmem:[%s1614_s1] sm:$0xff]  ;;  %s433_s24 = scalar_select %p432_p10, %s1410_s29, 1  ;;  %vm459_vm0 = vcmask 261120   ;;  %vm480_vm1 = vcmask 64512   ;;  %vm751_vm2 = vcmask 130048  }
  0x19   : > { %469 = vmatpush.bf16.msra.mxu0 %v1143_v0  ;;  %v1145_v0 = vld [vmem:[%s1597_s3 + $0x8] sm:$0xff]  ;;  %vm753_vm3 = vcmask 195584  }
  0x1a   : > { %s1066_s30 = sshll.u32 %s433_s24, 3  ;;  %v1210_v4 = vld [vmem:[%s1616_s2] ss:$0 sm:$0xff]  ;;  %s1307_s24 = smov 64  }
  0x1b   : > { %s435_s17 = scalar_lea.vmem %s1615_s0, %s1066_s30  ;;  %s1308_s30 = smov 80  }
  0x1c   : > { %v1448_v2 = vld [vmem:[%s435_s17] sm:$0xff]  ;;  %s1306_s17 = smov 120  }
  0x1d   : > { %470 = vmatpush.bf16.msra.mxu0 %v1142_v1  ;;  %v438_v3 = vpack.c.bf16 %v1448_v2, %v1448_v2  ;;  %v1144_v1 = vld [vmem:[%s1597_s3] sm:$0xff] }
  0x20   : > { %1075 = vmatmul.msk.bf16.vlgmr.msra.gmra.mxu0 %vm459_vm0, %v438_v3 }
  0x9d   : > { %v472_v5 = vpop.f32.mrf.mxu0 }
  0x9e   : > { %v1456_v6 = vadd.f32 %v1210_v4, %v472_v5 }
  0xa0   : > { %545 = vrot.lane.b32.xlu1 %v1456_v6, %s1304_s22  ;;  %478 = vrot.lane.b32.xlu0 %v1456_v6, %s1305_s23  ;;  %v476_v7 = vmul.f32 0.35355338, %v1456_v6  ;;  %s1313_s22 = smov 56   ;;  %s1314_s23 = smov 40  }
  0xa2   : > { %543 = vrot.lane.b32.xlu2 %v476_v7, %s1306_s17  ;;  %s1315_s17 = smov 24  }
  0xa5   : > { %v474_v8 = vpop.f32.mrf.mxu0 }
  0xaa   : > { %517 = vrot.lane.b32.xlu2 %v1456_v6, %s1307_s24  ;;  %s1316_s24 = smov 8  }
  0xb2   : > { %610 = vrot.lane.b32.xlu2 %v1456_v6, %s1308_s30  ;;  %s1317_s30 = smov 16  }
  0xba   : > { %608 = vrot.lane.b32.xlu2 %v476_v7, %s1309_s15  ;;  %s1139_s15 = sshll.u32 %s1410_s29, 3 }
  0xc2   : > { %675 = vrot.lane.b32.xlu2 %v1456_v6, %s1310_s16 }
  0xfc   : > { %v544_v9 = vpop.permute.xlu2 %543 }
 0x104   : > { %v518_v10 = vpop.permute.xlu2 %517 }
 0x10c   : > { %v611_v13 = vpop.permute.xlu2 %610 }
 0x112   : > { %v546_v11 = vpop.permute.xlu1 %545  ;;  %v479_v12 = vpop.permute.xlu0 %478 }
 0x113   : > { %1076 = vmatpush.xpose.msk.msra.mxu1 %vm480_vm1, %v479_v12  ;;  %1079 = vmatpush.xpose.msk.msra.mxu3 %vm480_vm1, %v546_v11 }
 0x114   : > { %v609_v18 = vpop.permute.xlu2 %608 }
 0x116   : > { %1077 = vmatmul.msk.f32.vlgmr.msra.gmra.mxu1 %vm480_vm1, %v476_v7  ;;  %1080 = vmatmul.msk.f32.vlgmr.msra.gmra.mxu3 %vm480_vm1, %v544_v9 }
 0x117   : > { %538 = vmatpush.msrb.mxu1 %v518_v10  ;;  %v1211_v10 = vld [vmem:[%s1598_s4] ss:$0 sm:$0xff] }
 0x119   : > { %1082 = vmatpush.xpose.msk.msra.mxu1 %vm480_vm1, %v611_v13 }
 0x11c   : > { %v676_v19 = vpop.permute.xlu2 %675 }
 0x193   : > { %v503_v14 = vpop.f32.mrf.mxu1 }
 0x194   : > { %v506_v15 = vsel %vm480_vm1, %v503_v14, -inf }
 0x195   : > { %507 = vmax.xlane.f32.xlu0 %v506_v15 }
 0x199   : > { %v568_v16 = vpop.f32.mrf.mxu3 }
 0x19a   : > { %v571_v17 = vsel %vm480_vm1, %v568_v16, -inf }
 0x19b   : > { %572 = vmax.xlane.f32.xlu2 %v571_v17 }
 0x208   : > { %v508_v20 = vpop.xlane.xlu0 %507 }
 0x209   : > { %v509_v21 = vsub.f32 %v503_v14, %v508_v20 }
 0x20b   : > { %v510_v22 = vmul.f32 1.442695, %v509_v21 }
 0x20d   : > { %1218 = vpow2.f32 %v510_v22 }
 0x20e   : > { %v573_v23 = vpop.xlane.xlu2 %572 }
 0x20f   : > { %v574_v24 = vsub.f32 %v568_v16, %v573_v23  ;;  %v1318_v16 = vmov 32.0  }
 0x211   : > { %v575_v25 = vmul.f32 1.442695, %v574_v24 }
 0x213   : > { %v1219_v26 = vpop.eup %1218  ;;  %1220 = vpow2.f32 %v575_v25 }
 0x214   : > { %v512_v27 = vsel %vm480_vm1, %v1219_v26, 0.0 }
 0x215   : > { %513 = vadd.xlane.f32.xlu1 %v512_v27  ;;  %v1147_v27 = vld [vmem:[%s1601_s7 + $0x8] sm:$0xff] }
 0x216   : > { %862 = vmatpush.bf16.msrb.mxu0 %v1147_v27 }
 0x219   : > { %v1221_v28 = vpop.eup %1220 }
 0x21a   : > { %v577_v29 = vsel %vm480_vm1, %v1221_v28, 0.0 }
 0x21b   : > { %578 = vadd.xlane.f32.xlu0 %v577_v29  ;;  %v1155_v29 = vld [vmem:[%s1603_s9 + $0x38] sm:$0xff] }
 0x21c   : > { %939 = vmatpush.bf16.msra.mxu2 %v1155_v29 }
 0x22e   : > { %673 = vrot.lane.b32.xlu1 %v476_v7, %s1311_s20 }
 0x288   : > { %v514_v30 = vpop.xlane.xlu1 %513 }
 0x289   : > { %1222 = vrcp.f32 %v514_v30 }
 0x28e   : > { %v579_v39 = vpop.xlane.xlu0 %578 }
 0x28f   : > { %v1223_v31 = vpop.eup %1222 }
 0x290   : > { %v516_v32 = vmul.f32 %v1223_v31, %v1219_v26 }
 0x292   : > { %1078 = vmatmul.msk.f32.vlgmr.msrb.gmra.mxu1 %vm480_vm1, %v516_v32  ;;  %v1154_v32 = vld [vmem:[%s1603_s9 + $0x30] sm:$0xff] }
 0x293   : > { %1085 = vmatpush.xpose.msk.msrb.mxu1 %vm480_vm1, %v676_v19  ;;  %940 = vmatpush.bf16.msra.mxu2 %v1154_v32 }
 0x29a   : > { %1083 = vmatmul.msk.f32.vlgmr.msra.gmra.mxu1 %vm480_vm1, %v609_v18 }
 0x2a0   : > { %v674_v33 = vpop.permute.xlu1 %673 }
 0x2a2   : > { %1086 = vmatmul.msk.f32.vlgmr.msrb.gmra.mxu1 %vm480_vm1, %v674_v33 }
 0x30f   : > { %v1477_v34 = vpop.f32.mrf.mxu1 }
 0x317   : > { %v633_v35 = vpop.f32.mrf.mxu1 }
 0x318   : > { %v636_v36 = vsel %vm480_vm1, %v633_v35, -inf }
 0x319   : > { %637 = vmax.xlane.f32.xlu1 %v636_v36 }
 0x31f   : > { %v698_v37 = vpop.f32.mrf.mxu1 }
 0x320   : > { %v701_v38 = vsel %vm480_vm1, %v698_v37, -inf }
 0x321   : > { %702 = vmax.xlane.f32.xlu0 %v701_v38  ;;  %v1151_v38 = vld [vmem:[%s1603_s9 + $0x18] sm:$0xff] }
 0x332   : > { %647 = vrot.lane.b32.xlu1 %v1456_v6, %s1312_s21 }
 0x38c   : > { %v638_v40 = vpop.xlane.xlu1 %637 }
 0x38d   : > { %v639_v41 = vsub.f32 %v633_v35, %v638_v40  ;;  %v1152_v35 = vld [vmem:[%s1603_s9 + $0x20] sm:$0xff] }
 0x38f   : > { %v640_v42 = vmul.f32 1.442695, %v639_v41  ;;  %v1150_v41 = vld [vmem:[%s1603_s9 + $0x10] sm:$0xff] }
 0x391   : > { %1224 = vpow2.f32 %v640_v42 }
 0x394   : > { %v703_v43 = vpop.xlane.xlu0 %702 }
 0x395   : > { %v704_v44 = vsub.f32 %v698_v37, %v703_v43 }
 0x397   : > { %v1225_v45 = vpop.eup %1224  ;;  %v705_v46 = vmul.f32 1.442695, %v704_v44  ;;  %v1212_v44 = vld [vmem:[%s1599_s5] ss:$0 sm:$0xff] }
 0x398   : > { %v642_v47 = vsel %vm480_vm1, %v1225_v45, 0.0 }
 0x399   : > { %1226 = vpow2.f32 %v705_v46  ;;  %643 = vadd.xlane.f32.xlu0 %v642_v47  ;;  %v1213_v47 = vld [vmem:[%s1600_s6] ss:$0 sm:$0xff] }
 0x39f   : > { %v1227_v48 = vpop.eup %1226 }
 0x3a0   : > { %v707_v49 = vsel %vm480_vm1, %v1227_v48, 0.0 }
 0x3a1   : > { %708 = vadd.xlane.f32.xlu2 %v707_v49 }
 0x3a4   : > { %v648_v58 = vpop.permute.xlu1 %647 }
 0x3ad   : > { %582 = vrot.lane.b32.xlu0 %v1456_v6, %s1313_s22 }
 0x3b9   : > { %712 = vrot.lane.b32.xlu2 %v1456_v6, %s1314_s23  ;;  %s997_s23 = scalar_lea.hbm %s1607_s13, %s1139_s15 }
 0x3ba   : > { %s1001_s2 = sshll.u32 %s997_s23, 4  ;;  %s1002_s2 = int_to_ptr.hbm [resolvable:$true] %s1001_s2 }
 0x3bb   : > { %s1254_s20 = sshra.s32 %s1002_s2, 4  ;;  %s1255_s20 = int_to_ptr.hbm [resolvable:$true] %s1254_s20 }
 0x3bc   : > { %s1256_s15 = scalar_lea.hbm %s1255_s20, 8  ;;  %p1261_p0 = scmp.lt.s32.totalorder %s1255_s20, %s1607_s13 }
 0x3bd   : > { %p1257_p11 = scmp.ne.s32.totalorder %s1255_s20, %s1256_s15 }
 0x3bf   : > { %p1258_p12 = pnand %p1257_p11, %p1427_p5 }
 0x3c1   : > { %p1259_p13 = pneg %p1258_p12 }
 0x40c   : > { %v644_v51 = vpop.xlane.xlu0 %643 }
 0x414   : > { %v709_v50 = vpop.xlane.xlu2 %708 }
 0x415   : > { %1228 = vrcp.f32 %v709_v50 }
 0x416   : > { %1230 = vrcp.f32 %v579_v39 }
 0x417   : > { %1232 = vrcp.f32 %v644_v51  ;;  %v1149_v51 = vld [vmem:[%s1603_s9 + $0x8] sm:$0xff] }
 0x418   : > { %1234 = vrcp.f32 %v1318_v16  ;;  %v1216_v16 = vld [vmem:[%s1605_s11] ss:$0 sm:$0xff] }
 0x41b   : > { %v1229_v52 = vpop.eup %1228 }
 0x41c   : > { %v1231_v53 = vpop.eup %1230  ;;  %v711_v54 = vmul.f32 %v1229_v52, %v1227_v48  ;;  %v713_v55 = vpop.permute.xlu2 %712  ;;  %v1148_v52 = vld [vmem:[%s1603_s9] sm:$0xff] }
 0x41d   : > { %733 = vmatpush.msra.mxu1 %v713_v55  ;;  %v581_v57 = vmul.f32 %v1231_v53, %v1221_v28  ;;  %v1233_v59 = vpop.eup %1232  ;;  %v1146_v28 = vld [vmem:[%s1601_s7] sm:$0xff] }
 0x41e   : > { %1087 = vmatmul.msk.f32.vlgmr.msra.gmra.mxu1 %vm480_vm1, %v711_v54  ;;  %v646_v60 = vmul.f32 %v1233_v59, %v1225_v45  ;;  %v1235_v17 = vpop.eup %1234  ;;  %863 = vmatpush.bf16.msrb.mxu0 %v1146_v28  ;;  %v1214_v53 = vld [vmem:[%s1602_s8] ss:$0 sm:$0xff] }
 0x41f   : > { %v583_v56 = vpop.permute.xlu0 %582  ;;  %v797_v18 = vmul.f32 32.0, %v1235_v17  ;;  %vm801_vm4 = vweird.f32 %v1235_v17  ;;  %v1215_v59 = vld [vmem:[%s1604_s10] ss:$0 sm:$0xff] }
 0x420   : > { %603 = vmatpush.msrb.mxu3 %v583_v56 }
 0x421   : > { %1081 = vmatmul.msk.f32.vlgmr.msrb.gmra.mxu3 %vm480_vm1, %v581_v57  ;;  %v798_v19 = vsub.f32 1.0, %v797_v18 }
 0x422   : > { %668 = vmatpush.msra.mxu3 %v648_v58 }
 0x423   : > { %v799_v20 = vmul.f32 %v1235_v17, %v798_v19  ;;  %v1217_v19 = vld [vmem:[%s1606_s12] ss:$0 sm:$0xff] }
 0x424   : > { %785 = vmatpush.bf16.msrb.mxu3 %v1145_v0 }
 0x425   : > { %v800_v21 = vadd.f32 %v1235_v17, %v799_v20 }
 0x427   : > { %v1503_v22 = vsel %vm801_vm4, %v1235_v17, %v800_v21 }
 0x428   : > { %786 = vmatpush.bf16.msrb.mxu3 %v1144_v1 }
 0x429   : > { %1084 = vmatmul.msk.f32.vlgmr.msra.gmra.mxu3 %vm480_vm1, %v646_v60 }
 0x49b   : > { %v735_v61 = vpop.f32.mrf.mxu1 }
 0x49c   : > { %747 = vrot.lane.b32.xlu1 %v735_v61, %s1315_s17 }
 0x4a4   : > { %v605_v62 = vpop.f32.mrf.mxu3 }
 0x4a5   : > { %739 = vrot.lane.b32.xlu0 %v605_v62, %s1316_s24  ;;  %s429_s24 = sand.u32 1, %s1294_s26  }
 0x4a6   : > { %s987_s16 = scalar_lea.sflag [#allocation3], %s429_s24 }
 0x4ac   : > { %v670_v63 = vpop.f32.mrf.mxu3 }
 0x4ad   : > { %743 = vrot.lane.b32.xlu0 %v670_v63, %s1317_s30  ;;  %s1065_s30 = sshll.u32 %s429_s24, 3 }
 0x4ae   : > { %s431_s1 = scalar_lea.vmem [#allocation2], %s1065_s30  ;;  %s1260_s30 = scalar_lea.hbm %s1607_s13, 16 }
 0x4af   : > { %s999_s29 = sshll.u32 %s431_s1, 4  ;;  %p1262_p1 = scmp.lt.s32.totalorder %s1260_s30, %s1256_s15  ;;  %s1000_s29 = int_to_ptr.vmem [resolvable:$true] %s999_s29 }
 0x4b1   : > { %p1263_p2 = por %p1262_p1, %p1261_p0 }
 0x4b3   : > { %p1264_p3 = pnand %p1263_p2, %p1259_p13 }
 0x50e   : > { %v748_v6 = vpop.permute.xlu1 %747 }
 0x517   : > { %v740_v3 = vpop.permute.xlu0 %739 }
 0x518   : > { %v750_v4 = vsel %vm480_vm1, %v1477_v34, %v740_v3  ;;  %v1153_v34 = vld [vmem:[%s1603_s9 + $0x28] sm:$0xff] }
 0x519   : > { %941 = vmatpush.bf16.msra.mxu2 %v1153_v34 }
 0x51d   : > { %942 = vmatpush.bf16.msra.mxu2 %v1152_v35 }
 0x51f   : > { %v744_v5 = vpop.permute.xlu0 %743 }
 0x520   : > { %v752_v7 = vsel %vm751_vm2, %v750_v4, %v744_v5 }
 0x521   : > { %v754_v8 = vsel %vm753_vm3, %v752_v7, %v748_v6  ;;  %943 = vmatpush.bf16.msra.mxu2 %v1151_v38 }
 0x522   : > { %v755_v9 = vpack.c.bf16 %v754_v8, %v754_v8 }
 0x524   : > { %1096 = vmatmul.msk.bf16.vlgmr.msrb.gmra.mxu3 %vm459_vm0, %v755_v9 }
 0x525   : > { %944 = vmatpush.bf16.msra.mxu2 %v1150_v41 }
 0x529   : > { %945 = vmatpush.bf16.msra.mxu2 %v1149_v51 }
 0x52d   : > { %946 = vmatpush.bf16.msra.mxu2 %v1148_v52 }
 0x5a7   : > { %v788_v11 = vpop.f32.mrf.mxu3 }
 0x5a8   : > { %v789_v12 = vadd.f32 %v1211_v10, %v788_v11 }
 0x5aa   : > { %v792_v13 = vadd.f32 %v789_v12, %v1448_v2 }
 0x5ac   : > { %v793_v14 = vsel %vm459_vm0, %v792_v13, 0.0 }
 0x5ad   : > { %794 = vadd.xlane.f32.xlu0 %v793_v14 }
 0x5af   : > { %v790_v15 = vpop.f32.mrf.mxu3 }
 0x620   : > { %v795_v23 = vpop.xlane.xlu0 %794 }
 0x621   : > { %v803_v24 = vmul.f32 %v1503_v22, %v795_v23 }
 0x623   : > { %v804_v25 = vsub.f32 %v792_v13, %v803_v24 }
 0x625   : > { %v805_v26 = vmul.f32 %v804_v25, %v804_v25 }
 0x627   : > { %v806_v2 = vsel %vm459_vm0, %v805_v26, 0.0 }
 0x628   : > { %807 = vadd.xlane.f32.xlu2 %v806_v2 }
 0x69b   : > { %v808_v30 = vpop.xlane.xlu2 %807 }
 0x69c   : > { %v809_v31 = vmul.f32 %v808_v30, %v1503_v22 }
 0x69e   : > { %v810_v33 = vadd.f32 1e-05, %v809_v31 }
 0x6a0   : > { %1236 = vrsqrt.f32 %v810_v33  ;;  %vm817_vm6 = vweird.f32 %v810_v33 }
 0x6a6   : > { %v1237_v36 = vpop.eup %1236 }
 0x6a7   : > { %v812_v37 = vmul.f32 %v1237_v36, %v810_v33  ;;  %vm818_vm5 = vweird.f32 %v1237_v36 }
 0x6a8   : > { %vm819_vm7 = vmor %vm817_vm6, %vm818_vm5 }
 0x6a9   : > { %v813_v39 = vmul.f32 %v1237_v36, %v812_v37 }
 0x6ab   : > { %v814_v40 = vmul.f32 0.5, %v813_v39 }
 0x6ad   : > { %v815_v42 = vsub.f32 1.5, %v814_v40 }
 0x6af   : > { %v816_v43 = vmul.f32 %v1237_v36, %v815_v42 }
 0x6b1   : > { %v820_v45 = vsel %vm819_vm7, %v1237_v36, %v816_v43 }
 0x6b2   : > { %v821_v46 = vmul.f32 %v820_v45, %v804_v25 }
 0x6b4   : > { %v826_v48 = vmul.f32 %v1212_v44, %v821_v46 }
 0x6b6   : > { %v831_v49 = vadd.f32 %v1213_v47, %v826_v48 }
 0x6b8   : > { %v832_v50 = vpack.c.bf16 %v831_v49, %v831_v49 }
 0x6ba   : > { %1105 = vmatmul.msk.bf16.vlgmr.msrb.gmra.mxu0 %vm459_vm0, %v832_v50 }
 0x737   : > { %v865_v54 = vpop.f32.mrf.mxu0 }
 0x738   : > { %v866_v55 = vadd.f32 %v1214_v53, %v865_v54 }
 0x73a   : > { %v869_v56 = vmax.f32 %v866_v55, 0.0 }
 0x73c   : > { %v870_v57 = vpack.c.bf16 %v869_v56, %v869_v56 }
 0x73e   : > { %947 = vmatmul.bf16.vlgmr.msra.gmra.mxu2 %v870_v57 }
 0x73f   : > { %v867_v58 = vpop.f32.mrf.mxu0 }
 0x7c1   : > { %v948_v60 = vpop.f32.mrf.mxu2 }
 0x7c2   : > { %v949_v61 = vadd.f32 %v1215_v59, %v948_v60 }
 0x7c4   : > { %v952_v62 = vadd.f32 %v949_v61, %v831_v49 }
 0x7c6   : > { %v953_v63 = vsel %vm459_vm0, %v952_v62, 0.0 }
 0x7c7   : > { %954 = vadd.xlane.f32.xlu1 %v953_v63 }
 0x7c9   : > { %v950_v0 = vpop.f32.mrf.mxu2 }
 0x83a   : > { %v955_v1 = vpop.xlane.xlu1 %954 }
 0x83b   : > { %v956_v3 = vmul.f32 %v955_v1, %v1503_v22 }
 0x83d   : > { %v957_v4 = vsub.f32 %v952_v62, %v956_v3 }
 0x83f   : > { %v958_v5 = vmul.f32 %v957_v4, %v957_v4 }
 0x841   : > { %v959_v6 = vsel %vm459_vm0, %v958_v5, 0.0 }
 0x842   : > { %960 = vadd.xlane.f32.xlu0 %v959_v6 }
 0x8b5   : > { %v961_v7 = vpop.xlane.xlu0 %960 }
 0x8b6   : > { %v962_v8 = vmul.f32 %v961_v7, %v1503_v22 }
 0x8b8   : > { %v963_v9 = vadd.f32 1e-05, %v962_v8 }
 0x8ba   : > { %1238 = vrsqrt.f32 %v963_v9  ;;  %vm970_vm9 = vweird.f32 %v963_v9 }
 0x8c0   : > { %v1239_v10 = vpop.eup %1238 }
 0x8c1   : > { %v965_v11 = vmul.f32 %v1239_v10, %v963_v9  ;;  %vm971_vm8 = vweird.f32 %v1239_v10 }
 0x8c2   : > { %vm972_vm10 = vmor %vm970_vm9, %vm971_vm8 }
 0x8c3   : > { %v966_v12 = vmul.f32 %v1239_v10, %v965_v11 }
 0x8c5   : > { %v967_v13 = vmul.f32 0.5, %v966_v12 }
 0x8c7   : > { %v968_v14 = vsub.f32 1.5, %v967_v13 }
 0x8c9   : > { %v969_v15 = vmul.f32 %v1239_v10, %v968_v14 }
 0x8cb   : > { %v973_v17 = vsel %vm972_vm10, %v1239_v10, %v969_v15 }
 0x8cc   : > { %v974_v18 = vmul.f32 %v973_v17, %v957_v4 }
 0x8ce   : > { %v979_v20 = vmul.f32 %v1216_v16, %v974_v18 }
 0x8d0   : > { %v984_v21 = vadd.f32 %v1217_v19, %v979_v20 }
 0x8d2   : > { %985 = vst.msk [vmem:[%s431_s1] sm:$0xff] %vm459_vm0, %v984_v21 }
 0x8d3   : > { %1267 = shalt.err (!%p1264_p3)
}
 0x8d4   : > { %1156 = dma.vmem_to_hbm [thread:$0]  (%p1427_p5), %s1000_s29, 128, %s1002_s2, %s987_s16  }
 0x8d5 PF: > { %p1162_p4 = scmp.ge.s32.totalorder %s1302_s28, 2  ;;  %s1013_s1 = sand.u32 1, %s1290_s25  }
 0x8d6   : > { %s1014_s24 = scalar_lea.sflag [#allocation3], %s1013_s1 }
 0x8d7   : > { %p1159_p7 = pnand %p1162_p4, %p1431_p6 }
 0x8d9   : > { %p1160_p8 = pneg %p1159_p7 }
 0x8db   : > { %1285 = dma.done.wait (%p1160_p8), %s1014_s24, 128  }
 0x8dc   : > { %1287 = vsyncadd (%p1160_p8), %s1014_s24, 4294967168  ;;  %s1617_s17 = sld [smem:[#allocation5_spill]]  ;;  %p23_p9 = scmp.ge.s32.totalorder %s1414_s14, 4  }
 0x8dd   : > { %s1618_s25 = smov %s1294_s26  ;;  %s1619_s26 = smov %s1298_s27 }
 0x8de   : > { %s1621_s28 = smov %s1414_s14  ;;  %25 = sbr.rel (!%p23_p9) target bundleno = 7 (0x7), region = 107 }
 0x8e2   : > { %s1620_s27 = smov %s1617_s17 }
 0x8e3   :  { %1020 = vsyncpa [#allocation3], 1 }
 0x8e4   :  { %1022 = vsyncpa [#allocation3 + $0x1], 1 }

</bundles_post_ra>
